<compile_context>
chip_gen: v6e
topology: v6e:2x2x1
jax: 0.10.0
libtpu: 0.0.40
codegen_flags: <defaults>
</compile_context>

<pallas_src>
import math
import functools

import jax
import jax.numpy as jnp
from jax.experimental import pallas as pl
from jax.experimental.pallas import tpu as pltpu


# ------------------------------ VMEM budgeting --------------------------------

def _vmem_limit_bytes():
    """Generation-aware VMEM budget (v7x: 64 MiB/TC, v5e/v6e: 128 MiB)."""
    cap = 128 * 1024 * 1024
    try:
        info = pltpu.get_tpu_info()
        cap = int(getattr(info, "vmem_capacity_bytes", cap))
    except Exception:
        pass
    # leave headroom for Mosaic-internal scratch; never request more than 100 MiB
    return int(min(cap - 8 * 1024 * 1024, 100 * 1024 * 1024))


# ----------------------------- in-kernel helpers -------------------------------

def _layernorm(x, w, b, eps=1e-5):
    # PyTorch nn.LayerNorm: biased variance over last dim, eps=1e-5, f32 math.
    mu = jnp.mean(x, axis=-1, keepdims=True)
    var = jnp.mean((x - mu) ** 2, axis=-1, keepdims=True)
    return (x - mu) * jax.lax.rsqrt(var + eps) * w + b


# --------------------------- fused encoder-stack kernel ------------------------

def encoder_stack_kernel(x_ref, mask_ref,
                         wqkv_ref, bqkv_ref, wo_ref, bo_ref,
                         ln1w_ref, ln1b_ref, ln2w_ref, ln2b_ref,
                         w1_ref, b1_ref, w2_ref, b2_ref,
                         y_ref, carry_ref, *, num_heads):
    """grid = (batch, layer); carry_ref holds this batch row's (S, D) activation."""
    l = pl.program_id(1)
    S, D = carry_ref.shape
    H = num_heads
    hd = D // H

    # ---- layer 0: load the embedded + positional input into the carry ----
    @pl.when(l == 0)
    def _():
        carry_ref[...] = x_ref[...]

    x = carry_ref[...]                                          # (S, D) f32

    # ---- fused QKV projection: ONE (S, D) @ (D, 3D) MXU pass (N = 3D) ----
    qkv = jnp.dot(x.astype(jnp.bfloat16), wqkv_ref[...],
                  preferred_element_type=jnp.float32) + bqkv_ref[...]   # (S, 3D) f32
    # D-aligned (128-lane) q / k / v slices; 1/sqrt(hd) is pre-folded into Wq/bq.
    q = qkv[:, 0:D].astype(jnp.bfloat16)
    k = qkv[:, D:2 * D].astype(jnp.bfloat16)
    v = qkv[:, 2 * D:3 * D].astype(jnp.bfloat16)

    # head split via static lane slices + major-axis stack (no lane-dim reshapes)
    qh = jnp.stack([q[:, h * hd:(h + 1) * hd] for h in range(H)], axis=0)  # (H,S,hd)
    kh = jnp.stack([k[:, h * hd:(h + 1) * hd] for h in range(H)], axis=0)
    vh = jnp.stack([v[:, h * hd:(h + 1) * hd] for h in range(H)], axis=0)

    s = jnp.einsum('hqc,hkc->hqk', qh, kh,
                   preferred_element_type=jnp.float32)           # (H, S, S) f32
    # precomputed additive causal mask (0 / -1e30); constant tied to f32 scores
    s = s + mask_ref[...][None, :, :]

    m = jnp.max(s, axis=-1, keepdims=True)
    e = jnp.exp(s - m)
    p = e * pl.reciprocal(jnp.sum(e, axis=-1, keepdims=True), approx=True)

    ctx = jnp.einsum('hqk,hkc->hqc', p.astype(jnp.bfloat16), vh,
                     preferred_element_type=jnp.float32)         # (H, S, hd) f32

    # merge heads along lanes (head-major, matches W_o packing), then ONE
    # (S, D) @ (D, D) out-projection pass — no (H, S, D) f32 intermediate and
    # no cross-head VPU reduction.
    ctx = jnp.concatenate([ctx[h].astype(jnp.bfloat16) for h in range(H)],
                          axis=-1)                               # (S, D) bf16
    attn = jnp.dot(ctx, wo_ref[...],
                   preferred_element_type=jnp.float32) + bo_ref[...]     # (S, D) f32

    # residual + LayerNorm1 (post-norm); dropout = identity in eval mode
    x = _layernorm(x + attn, ln1w_ref[...], ln1b_ref[...])

    # ---- feed-forward: Linear -> ReLU -> Linear (bf16 matmuls, f32 acc) ----
    # TODO(synk): at realistic D/Dff (e.g. 1024/4096), tile Dff with an inner
    #             pipeline (pltpu.emit_pipeline over (D, tDff)/(tDff, D) chunks)
    #             so only a slice of the FFN weights is resident at a time.
    h1 = jnp.dot(x.astype(jnp.bfloat16), w1_ref[...],
                 preferred_element_type=jnp.float32) + b1_ref[...]
    h1 = jnp.maximum(h1, 0.0)
    ff = jnp.dot(h1.astype(jnp.bfloat16), w2_ref[...],
                 preferred_element_type=jnp.float32) + b2_ref[...]
    x = _layernorm(x + ff, ln2w_ref[...], ln2b_ref[...])

    carry_ref[...] = x

    # ---- last layer: emit this batch row's final activation ----
    @pl.when(l == pl.num_programs(1) - 1)
    def _():
        y_ref[...] = x


def run_encoder_stack(x, mask, packed, num_heads):
    B, S, D = x.shape
    L = packed["wqkv"].shape[0]
    Dff = packed["w1"].shape[2]

    def per_batch(shape):      # blocked on the (parallel) batch axis, L-dim squeezed
        return pl.BlockSpec((None,) + tuple(shape[1:]),
                            lambda b, l: (b,) + (0,) * (len(shape) - 1))

    def per_layer(shape):      # blocked on the (sequential) layer axis, L-dim squeezed
        return pl.BlockSpec((None,) + tuple(shape[1:]),
                            lambda b, l: (l,) + (0,) * (len(shape) - 1))

    def const(shape):
        return pl.BlockSpec(tuple(shape), lambda b, l: (0,) * len(shape))

    in_specs = [
        per_batch((B, S, D)),                                   # embedded + PE input
        const((S, S)),                                          # additive causal mask
        per_layer((L, D, 3 * D)), per_layer((L, 1, 3 * D)),     # fused QKV weight / bias
        per_layer((L, D, D)), per_layer((L, 1, D)),             # attn out-proj weight / bias
        per_layer((L, 1, D)), per_layer((L, 1, D)),             # norm1 weight / bias
        per_layer((L, 1, D)), per_layer((L, 1, D)),             # norm2 weight / bias
        per_layer((L, D, Dff)), per_layer((L, 1, Dff)),         # linear1 weight / bias
        per_layer((L, Dff, D)), per_layer((L, 1, D)),           # linear2 weight / bias
    ]

    kern = functools.partial(encoder_stack_kernel, num_heads=num_heads)
    return pl.pallas_call(
        kern,
        out_shape=jax.ShapeDtypeStruct((B, S, D), jnp.float32),
        grid=(B, L),
        in_specs=in_specs,
        out_specs=per_batch((B, S, D)),
        scratch_shapes=[pltpu.VMEM((S, D), jnp.float32)],       # layer-to-layer carry
        compiler_params=pltpu.CompilerParams(
            # batch axis shards across TensorCores (v7x megacore); layers sequential
            dimension_semantics=("parallel", "arbitrary"),
            vmem_limit_bytes=_vmem_limit_bytes()),
    )(x, mask, packed["wqkv"], packed["bqkv"], packed["wo"], packed["bo"],
      packed["ln1w"], packed["ln1b"], packed["ln2w"], packed["ln2b"],
      packed["w1"], packed["b1"], packed["w2"], packed["b2"])


# --------------------- tiled output projection (vocab logits) ------------------

def out_proj_kernel(x_ref, w_ref, b_ref, o_ref):
    o_ref[...] = jnp.dot(x_ref[...].astype(jnp.bfloat16), w_ref[...],
                         preferred_element_type=jnp.float32) + b_ref[...]


def _pick_tile(dim, cap, mult):
    """Largest multiple of `mult` that divides `dim` and is <= cap; else full dim."""
    if dim <= cap:
        return dim
    t = (cap // mult) * mult
    while t >= mult:
        if dim % t == 0:
            return t
        t -= mult
    return dim


def run_output_projection(h, out_w, out_b):
    B, S, D = h.shape
    V = out_w.shape[1]
    BS = B * S
    x2 = h.reshape(BS, D)
    tm = _pick_tile(BS, 256, 8)
    tn = _pick_tile(V, 512, 128)
    # TODO(synk): for very large D, add a K grid axis with an f32 accumulator scratch.

    out = pl.pallas_call(
        out_proj_kernel,
        out_shape=jax.ShapeDtypeStruct((BS, V), jnp.float32),
        grid=(BS // tm, V // tn),
        in_specs=[
            pl.BlockSpec((tm, D), lambda m, n: (m, 0)),
            pl.BlockSpec((D, tn), lambda m, n: (0, n)),
            pl.BlockSpec((1, tn), lambda m, n: (0, n)),
        ],
        out_specs=pl.BlockSpec((tm, tn), lambda m, n: (m, n)),
        compiler_params=pltpu.CompilerParams(
            dimension_semantics=("parallel", "parallel"),
            vmem_limit_bytes=_vmem_limit_bytes()),
    )(x2, out_w, out_b)
    return out.reshape(B, S, V)


# -------------------------------- plain-JAX glue --------------------------------

def make_positional_encoding(d_model, max_length):
    pe = jnp.zeros((max_length, d_model), jnp.float32)
    position = jnp.arange(max_length, dtype=jnp.float32)[:, None]
    div_term = jnp.exp(jnp.arange(0, d_model, 2, dtype=jnp.float32)
                       * (-math.log(10000.0) / d_model))
    pe = pe.at[:, 0::2].set(jnp.sin(position * div_term))
    if d_model % 2 == 1:
        pe = pe.at[:, 1::2].set(jnp.cos(position * div_term[:-1]))
    else:
        pe = pe.at[:, 1::2].set(jnp.cos(position * div_term))
    return pe


def apply_positional_encoding(x_sbd, pe):
    # x_sbd: (seq, batch, d_model). Reproduce the module's branching EXACTLY
    # (including the quirk of slicing pe by the batch dim when batch <= seq).
    s, b, _ = x_sbd.shape
    if s <= 1000 and b > s:
        pe_slice = pe[:s, :][:, None, :]          # (s, 1, d)
    else:
        pe_slice = pe[:b, :][None, :, :]          # (1, b, d)
    return x_sbd + pe_slice


def make_additive_causal_mask(S):
    row = jnp.arange(S)[:, None]
    col = jnp.arange(S)[None, :]
    # large finite negative tied to the f32 score dtype (never -inf / bf16)
    return jnp.where(col <= row, 0.0, -1e30).astype(jnp.float32)


def transformer_forward(params, packed, tokens, num_heads):
    D = params["embedding"].shape[1]
    B, S = tokens.shape
    # nn.Embedding gather + sqrt(d_model) scale (host-side glue)
    x = params["embedding"][tokens] * math.sqrt(D)              # (B, S, D)
    # positional encoding on the (S, B, D) view, then back to (B, S, D)
    x = jnp.transpose(x, (1, 0, 2))
    x = apply_positional_encoding(x, params["pe"])
    x = jnp.transpose(x, (1, 0, 2))
    # self.dropout(x): identity in eval mode
    mask = make_additive_causal_mask(S)
    h = run_encoder_stack(x, mask, packed, num_heads)
    return run_output_projection(h, packed["out_w"], packed["out_b"])


# -------------------- parameters (PyTorch layout) + packing ---------------------

def init_torch_style_params(key, vocab_size, d_model, d_ff, num_layers, max_length):
    keys = jax.random.split(key, 2 + num_layers)

    def w(k, shape, scale=0.02):
        return (scale * jax.random.normal(k, shape)).astype(jnp.float32)

    layers = []
    for li in range(num_layers):
        lk = jax.random.split(keys[2 + li], 4)
        layers.append(dict(
            in_proj_w=w(lk[0], (3 * d_model, d_model)),         # [Wq; Wk; Wv]
            in_proj_b=jnp.zeros((3 * d_model,), jnp.float32),
            out_proj_w=w(lk[1], (d_model, d_model)),
            out_proj_b=jnp.zeros((d_model,), jnp.float32),
            ln1_w=jnp.ones((d_model,), jnp.float32),
            ln1_b=jnp.zeros((d_model,), jnp.float32),
            ln2_w=jnp.ones((d_model,), jnp.float32),
            ln2_b=jnp.zeros((d_model,), jnp.float32),
            lin1_w=w(lk[2], (d_ff, d_model)),
            lin1_b=jnp.zeros((d_ff,), jnp.float32),
            lin2_w=w(lk[3], (d_model, d_ff)),
            lin2_b=jnp.zeros((d_model,), jnp.float32),
        ))
    return dict(
        embedding=w(keys[0], (vocab_size, d_model), scale=1.0),
        pe=make_positional_encoding(d_model, max_length),
        layers=layers,
        out_w=w(keys[1], (vocab_size, d_model)),
        out_b=jnp.zeros((vocab_size,), jnp.float32),
    )


def pack_for_kernel(params, num_heads):
    """Host-side (free) repack: pre-transposed bf16 matmul weights, layer-stacked,
    with the 1/sqrt(hd) attention scale folded into Wq / bq."""
    H = num_heads
    layers = params["layers"]
    D = layers[0]["out_proj_w"].shape[0]
    hd = D // H
    scale = 1.0 / math.sqrt(hd)
    bf16 = jnp.bfloat16

    def qkv_w(lyr):                               # (3D, D) -> (D, 3D), q pre-scaled
        wm = lyr["in_proj_w"]
        wq, wk, wv = wm[:D] * scale, wm[D:2 * D], wm[2 * D:]
        return jnp.concatenate([wq, wk, wv], axis=0).T

    def qkv_b(lyr):                               # (3D,) -> (1, 3D), q pre-scaled
        bv = lyr["in_proj_b"]
        return jnp.concatenate([bv[:D] * scale, bv[D:2 * D], bv[2 * D:]])[None, :]

    stack = lambda f: jnp.stack([f(lyr) for lyr in layers], axis=0)
    return dict(
        wqkv=stack(qkv_w).astype(bf16),                           # (L, D, 3D)
        bqkv=stack(qkv_b),                                        # (L, 1, 3D)
        wo=stack(lambda l: l["out_proj_w"].T).astype(bf16),       # (L, D, D)
        bo=stack(lambda l: l["out_proj_b"][None, :]),             # (L, 1, D)
        ln1w=stack(lambda l: l["ln1_w"][None, :]),
        ln1b=stack(lambda l: l["ln1_b"][None, :]),
        ln2w=stack(lambda l: l["ln2_w"][None, :]),
        ln2b=stack(lambda l: l["ln2_b"][None, :]),
        w1=stack(lambda l: l["lin1_w"].T).astype(bf16),           # (L, D, Dff)
        b1=stack(lambda l: l["lin1_b"][None, :]),                 # (L, 1, Dff)
        w2=stack(lambda l: l["lin2_w"].T).astype(bf16),           # (L, Dff, D)
        b2=stack(lambda l: l["lin2_b"][None, :]),                 # (L, 1, D)
        out_w=params["out_w"].T.astype(bf16),                     # (D, V)
        out_b=params["out_b"][None, :],                           # (1, V)
    )


# ------------------------------------- main --------------------------------------

if __name__ == "__main__":
    # Small config consistent with the module (d_model=128, nhead=8, d_ff=512, max_length=32)
    vocab_size = 128
    d_model = 128
    num_heads = 8
    num_layers = 2
    d_ff = 512
    max_length = 32
    batch, seq = 2, 8
    # TODO(synk): at this toy size (S=8) the score/softmax tiles are >90% lane padding;
    #             benchmark/tune with S a multiple of 128 before drawing perf conclusions.

    key = jax.random.PRNGKey(0)
    pkey, tkey = jax.random.split(key)
    params = init_torch_style_params(pkey, vocab_size, d_model, d_ff,
                                     num_layers, max_length)
    packed = pack_for_kernel(params, num_heads)
    tokens = jax.random.randint(tkey, (batch, seq), 0, vocab_size, dtype=jnp.int32)

    logits = transformer_forward(params, packed, tokens, num_heads)
    logits = jax.block_until_ready(logits)
    assert logits.shape == (batch, seq, vocab_size)
    assert bool(jnp.all(jnp.isfinite(logits)))
    print("KERNEL_OK")
</pallas_src>

<mosaic_0001>
module attributes {stable_mosaic.version = 11 : i64} {
  func.func @encoder_stack_kernel(%arg0: i32, %arg1: i32, %arg2: memref<1x8x128xf32, #tpu.memory_space<vmem>>, %arg3: memref<8x8xf32, #tpu.memory_space<vmem>>, %arg4: memref<1x128x384xbf16, #tpu.memory_space<vmem>>, %arg5: memref<1x1x384xf32, #tpu.memory_space<vmem>>, %arg6: memref<1x128x128xbf16, #tpu.memory_space<vmem>>, %arg7: memref<1x1x128xf32, #tpu.memory_space<vmem>>, %arg8: memref<1x1x128xf32, #tpu.memory_space<vmem>>, %arg9: memref<1x1x128xf32, #tpu.memory_space<vmem>>, %arg10: memref<1x1x128xf32, #tpu.memory_space<vmem>>, %arg11: memref<1x1x128xf32, #tpu.memory_space<vmem>>, %arg12: memref<1x128x512xbf16, #tpu.memory_space<vmem>>, %arg13: memref<1x1x512xf32, #tpu.memory_space<vmem>>, %arg14: memref<1x512x128xbf16, #tpu.memory_space<vmem>>, %arg15: memref<1x1x128xf32, #tpu.memory_space<vmem>>, %arg16: memref<1x8x128xf32, #tpu.memory_space<vmem>>, %arg17: memref<8x128xf32, #tpu.memory_space<vmem>>) attributes {dimension_semantics = [#tpu.dimension_semantics<parallel>, #tpu.dimension_semantics<arbitrary>], iteration_bounds = array<i64: 2, 2>, scalar_prefetch = 0 : i64, scratch_operands = 1 : i64, tpu.core_type = #tpu.core_type<tc>, window_params = [{transform_indices = @transform_0, window_bounds = array<i64: 1, 8, 128>}, {pipeline_mode = #tpu.pipeline_mode<synchronous>, transform_indices = @transform_1, window_bounds = array<i64: 8, 8>}, {transform_indices = @transform_2, window_bounds = array<i64: 1, 128, 384>}, {transform_indices = @transform_3, window_bounds = array<i64: 1, 1, 384>}, {transform_indices = @transform_4, window_bounds = array<i64: 1, 128, 128>}, {transform_indices = @transform_5, window_bounds = array<i64: 1, 1, 128>}, {transform_indices = @transform_6, window_bounds = array<i64: 1, 1, 128>}, {transform_indices = @transform_7, window_bounds = array<i64: 1, 1, 128>}, {transform_indices = @transform_8, window_bounds = array<i64: 1, 1, 128>}, {transform_indices = @transform_9, window_bounds = array<i64: 1, 1, 128>}, {transform_indices = @transform_10, window_bounds = array<i64: 1, 128, 512>}, {transform_indices = @transform_11, window_bounds = array<i64: 1, 1, 512>}, {transform_indices = @transform_12, window_bounds = array<i64: 1, 512, 128>}, {transform_indices = @transform_13, window_bounds = array<i64: 1, 1, 128>}, {transform_indices = @transform_14, window_bounds = array<i64: 1, 8, 128>}]} {
    %c0_i32 = arith.constant 0 : i32
    %0 = arith.cmpi eq, %arg1, %c0_i32 : i32
    %1 = arith.extui %0 : i1 to i32
    %c0_i32_0 = arith.constant 0 : i32
    %2 = arith.cmpi ne, %1, %c0_i32_0 : i32
    scf.if %2 {
      %c0_61 = arith.constant 0 : index
      %c0_62 = arith.constant 0 : index
      %c0_63 = arith.constant 0 : index
      %194 = vector.load %arg2[%c0_61, %c0_62, %c0_63] : memref<1x8x128xf32, #tpu.memory_space<vmem>>, vector<1x8x128xf32>
      %195 = vector.shape_cast %194 : vector<1x8x128xf32> to vector<8x128xf32>
      %c0_64 = arith.constant 0 : index
      %c0_65 = arith.constant 0 : index
      %196 = vector.load %arg17[%c0_64, %c0_65] : memref<8x128xf32, #tpu.memory_space<vmem>>, vector<8x128xf32>
      tpu.vector_store %arg17[%c0_64, %c0_65], %195 {strides = array<i32>} : memref<8x128xf32, #tpu.memory_space<vmem>>, vector<8x128xf32>,
    } else {
    }
    %c0 = arith.constant 0 : index
    %c0_1 = arith.constant 0 : index
    %3 = vector.load %arg17[%c0, %c0_1] : memref<8x128xf32, #tpu.memory_space<vmem>>, vector<8x128xf32>
    %4 = arith.truncf %3 : vector<8x128xf32> to vector<8x128xbf16>
    %c0_2 = arith.constant 0 : index
    %c0_3 = arith.constant 0 : index
    %c0_4 = arith.constant 0 : index
    %5 = vector.load %arg4[%c0_2, %c0_3, %c0_4] : memref<1x128x384xbf16, #tpu.memory_space<vmem>>, vector<1x128x384xbf16>
    %6 = vector.shape_cast %5 : vector<1x128x384xbf16> to vector<128x384xbf16>
    %cst = arith.constant dense<0.000000e+00> : vector<8x384xf32>
    %7 = tpu.matmul %4, %6, %cst {dimension_numbers = #tpu.dot_dimension_numbers<[1], [0], [0], [1], [0, 0, 1, 1], [], []>} : vector<8x128xbf16>, vector<128x384xbf16>, vector<8x384xf32> -> vector<8x384xf32>
    %c0_5 = arith.constant 0 : index
    %c0_6 = arith.constant 0 : index
    %c0_7 = arith.constant 0 : index
    %8 = vector.load %arg5[%c0_5, %c0_6, %c0_7] : memref<1x1x384xf32, #tpu.memory_space<vmem>>, vector<1x1x384xf32>
    %9 = vector.shape_cast %8 : vector<1x1x384xf32> to vector<1x384xf32>
    %10 = vector.broadcast %9 : vector<1x384xf32> to vector<8x384xf32>
    %11 = arith.addf %7, %10 : vector<8x384xf32>
    %12 = vector.extract_strided_slice %11 {offsets = [0, 0], sizes = [8, 128], strides = [1, 1]} : vector<8x384xf32> to vector<8x128xf32>
    %13 = arith.truncf %12 : vector<8x128xf32> to vector<8x128xbf16>
    %14 = vector.extract_strided_slice %11 {offsets = [0, 128], sizes = [8, 128], strides = [1, 1]} : vector<8x384xf32> to vector<8x128xf32>
    %15 = arith.truncf %14 : vector<8x128xf32> to vector<8x128xbf16>
    %16 = vector.extract_strided_slice %11 {offsets = [0, 256], sizes = [8, 128], strides = [1, 1]} : vector<8x384xf32> to vector<8x128xf32>
    %17 = arith.truncf %16 : vector<8x128xf32> to vector<8x128xbf16>
    %18 = vector.extract_strided_slice %13 {offsets = [0, 0], sizes = [8, 16], strides = [1, 1]} : vector<8x128xbf16> to vector<8x16xbf16>
    %19 = vector.extract_strided_slice %13 {offsets = [0, 16], sizes = [8, 16], strides = [1, 1]} : vector<8x128xbf16> to vector<8x16xbf16>
    %20 = vector.extract_strided_slice %13 {offsets = [0, 32], sizes = [8, 16], strides = [1, 1]} : vector<8x128xbf16> to vector<8x16xbf16>
    %21 = vector.extract_strided_slice %13 {offsets = [0, 48], sizes = [8, 16], strides = [1, 1]} : vector<8x128xbf16> to vector<8x16xbf16>
    %22 = vector.extract_strided_slice %13 {offsets = [0, 64], sizes = [8, 16], strides = [1, 1]} : vector<8x128xbf16> to vector<8x16xbf16>
    %23 = vector.extract_strided_slice %13 {offsets = [0, 80], sizes = [8, 16], strides = [1, 1]} : vector<8x128xbf16> to vector<8x16xbf16>
    %24 = vector.extract_strided_slice %13 {offsets = [0, 96], sizes = [8, 16], strides = [1, 1]} : vector<8x128xbf16> to vector<8x16xbf16>
    %25 = vector.extract_strided_slice %13 {offsets = [0, 112], sizes = [8, 16], strides = [1, 1]} : vector<8x128xbf16> to vector<8x16xbf16>
    %26 = vector.shape_cast %18 : vector<8x16xbf16> to vector<1x8x16xbf16>
    %27 = vector.shape_cast %19 : vector<8x16xbf16> to vector<1x8x16xbf16>
    %28 = vector.shape_cast %20 : vector<8x16xbf16> to vector<1x8x16xbf16>
    %29 = vector.shape_cast %21 : vector<8x16xbf16> to vector<1x8x16xbf16>
    %30 = vector.shape_cast %22 : vector<8x16xbf16> to vector<1x8x16xbf16>
    %31 = vector.shape_cast %23 : vector<8x16xbf16> to vector<1x8x16xbf16>
    %32 = vector.shape_cast %24 : vector<8x16xbf16> to vector<1x8x16xbf16>
    %33 = vector.shape_cast %25 : vector<8x16xbf16> to vector<1x8x16xbf16>
    %34 = tpu.concatenate %26, %27, %28, %29, %30, %31, %32, %33 in 0 : vector<1x8x16xbf16>, vector<1x8x16xbf16>, vector<1x8x16xbf16>, vector<1x8x16xbf16>, vector<1x8x16xbf16>, vector<1x8x16xbf16>, vector<1x8x16xbf16>, vector<1x8x16xbf16> -> vector<8x8x16xbf16>
    %35 = vector.extract_strided_slice %15 {offsets = [0, 0], sizes = [8, 16], strides = [1, 1]} : vector<8x128xbf16> to vector<8x16xbf16>
    %36 = vector.extract_strided_slice %15 {offsets = [0, 16], sizes = [8, 16], strides = [1, 1]} : vector<8x128xbf16> to vector<8x16xbf16>
    %37 = vector.extract_strided_slice %15 {offsets = [0, 32], sizes = [8, 16], strides = [1, 1]} : vector<8x128xbf16> to vector<8x16xbf16>
    %38 = vector.extract_strided_slice %15 {offsets = [0, 48], sizes = [8, 16], strides = [1, 1]} : vector<8x128xbf16> to vector<8x16xbf16>
    %39 = vector.extract_strided_slice %15 {offsets = [0, 64], sizes = [8, 16], strides = [1, 1]} : vector<8x128xbf16> to vector<8x16xbf16>
    %40 = vector.extract_strided_slice %15 {offsets = [0, 80], sizes = [8, 16], strides = [1, 1]} : vector<8x128xbf16> to vector<8x16xbf16>
    %41 = vector.extract_strided_slice %15 {offsets = [0, 96], sizes = [8, 16], strides = [1, 1]} : vector<8x128xbf16> to vector<8x16xbf16>
    %42 = vector.extract_strided_slice %15 {offsets = [0, 112], sizes = [8, 16], strides = [1, 1]} : vector<8x128xbf16> to vector<8x16xbf16>
    %43 = vector.shape_cast %35 : vector<8x16xbf16> to vector<1x8x16xbf16>
    %44 = vector.shape_cast %36 : vector<8x16xbf16> to vector<1x8x16xbf16>
    %45 = vector.shape_cast %37 : vector<8x16xbf16> to vector<1x8x16xbf16>
    %46 = vector.shape_cast %38 : vector<8x16xbf16> to vector<1x8x16xbf16>
    %47 = vector.shape_cast %39 : vector<8x16xbf16> to vector<1x8x16xbf16>
    %48 = vector.shape_cast %40 : vector<8x16xbf16> to vector<1x8x16xbf16>
    %49 = vector.shape_cast %41 : vector<8x16xbf16> to vector<1x8x16xbf16>
    %50 = vector.shape_cast %42 : vector<8x16xbf16> to vector<1x8x16xbf16>
    %51 = tpu.concatenate %43, %44, %45, %46, %47, %48, %49, %50 in 0 : vector<1x8x16xbf16>, vector<1x8x16xbf16>, vector<1x8x16xbf16>, vector<1x8x16xbf16>, vector<1x8x16xbf16>, vector<1x8x16xbf16>, vector<1x8x16xbf16>, vector<1x8x16xbf16> -> vector<8x8x16xbf16>
    %52 = vector.extract_strided_slice %17 {offsets = [0, 0], sizes = [8, 16], strides = [1, 1]} : vector<8x128xbf16> to vector<8x16xbf16>
    %53 = vector.extract_strided_slice %17 {offsets = [0, 16], sizes = [8, 16], strides = [1, 1]} : vector<8x128xbf16> to vector<8x16xbf16>
    %54 = vector.extract_strided_slice %17 {offsets = [0, 32], sizes = [8, 16], strides = [1, 1]} : vector<8x128xbf16> to vector<8x16xbf16>
    %55 = vector.extract_strided_slice %17 {offsets = [0, 48], sizes = [8, 16], strides = [1, 1]} : vector<8x128xbf16> to vector<8x16xbf16>
    %56 = vector.extract_strided_slice %17 {offsets = [0, 64], sizes = [8, 16], strides = [1, 1]} : vector<8x128xbf16> to vector<8x16xbf16>
    %57 = vector.extract_strided_slice %17 {offsets = [0, 80], sizes = [8, 16], strides = [1, 1]} : vector<8x128xbf16> to vector<8x16xbf16>
    %58 = vector.extract_strided_slice %17 {offsets = [0, 96], sizes = [8, 16], strides = [1, 1]} : vector<8x128xbf16> to vector<8x16xbf16>
    %59 = vector.extract_strided_slice %17 {offsets = [0, 112], sizes = [8, 16], strides = [1, 1]} : vector<8x128xbf16> to vector<8x16xbf16>
    %60 = vector.shape_cast %52 : vector<8x16xbf16> to vector<1x8x16xbf16>
    %61 = vector.shape_cast %53 : vector<8x16xbf16> to vector<1x8x16xbf16>
    %62 = vector.shape_cast %54 : vector<8x16xbf16> to vector<1x8x16xbf16>
    %63 = vector.shape_cast %55 : vector<8x16xbf16> to vector<1x8x16xbf16>
    %64 = vector.shape_cast %56 : vector<8x16xbf16> to vector<1x8x16xbf16>
    %65 = vector.shape_cast %57 : vector<8x16xbf16> to vector<1x8x16xbf16>
    %66 = vector.shape_cast %58 : vector<8x16xbf16> to vector<1x8x16xbf16>
    %67 = vector.shape_cast %59 : vector<8x16xbf16> to vector<1x8x16xbf16>
    %68 = tpu.concatenate %60, %61, %62, %63, %64, %65, %66, %67 in 0 : vector<1x8x16xbf16>, vector<1x8x16xbf16>, vector<1x8x16xbf16>, vector<1x8x16xbf16>, vector<1x8x16xbf16>, vector<1x8x16xbf16>, vector<1x8x16xbf16>, vector<1x8x16xbf16> -> vector<8x8x16xbf16>
    "tpu.trace_start"() <{level = 10 : i32, message = "hqc,hkc->hqk"}> : () -> ()
    %cst_8 = arith.constant dense<0.000000e+00> : vector<8x8x8xf32>
    %69 = tpu.matmul %34, %51, %cst_8 {dimension_numbers = #tpu.dot_dimension_numbers<[2], [2], [1], [1], [0, 0, 0, 1, 1, 1], [0], [0]>} : vector<8x8x16xbf16>, vector<8x8x16xbf16>, vector<8x8x8xf32> -> vector<8x8x8xf32>
    "tpu.trace_stop"() : () -> ()
    %c0_9 = arith.constant 0 : index
    %c0_10 = arith.constant 0 : index
    %70 = vector.load %arg3[%c0_9, %c0_10] : memref<8x8xf32, #tpu.memory_space<vmem>>, vector<8x8xf32>
    %71 = vector.shape_cast %70 : vector<8x8xf32> to vector<1x8x8xf32>
    %72 = vector.broadcast %71 : vector<1x8x8xf32> to vector<8x8x8xf32>
    %73 = arith.addf %69, %72 : vector<8x8x8xf32>
    %cst_11 = arith.constant dense<0xFF800000> : vector<8x8xf32>
    %74 = vector.multi_reduction <maximumf>, %73, %cst_11 [2] : vector<8x8x8xf32> to vector<8x8xf32>
    %75 = vector.shape_cast %74 : vector<8x8xf32> to vector<8x8x1xf32>
    %76 = vector.broadcast %75 : vector<8x8x1xf32> to vector<8x8x8xf32>
    %77 = arith.subf %73, %76 : vector<8x8x8xf32>
    %78 = math.exp %77 : vector<8x8x8xf32>
    %cst_12 = arith.constant dense<0.000000e+00> : vector<8x8xf32>
    %79 = vector.multi_reduction <add>, %78, %cst_12 [2] : vector<8x8x8xf32> to vector<8x8xf32>
    %80 = vector.shape_cast %79 : vector<8x8xf32> to vector<8x8x1xf32>
    %81 = tpu.reciprocal %80 {approx = true} : vector<8x8x1xf32> -> vector<8x8x1xf32>
    %82 = vector.broadcast %81 : vector<8x8x1xf32> to vector<8x8x8xf32>
    %83 = arith.mulf %78, %82 : vector<8x8x8xf32>
    %84 = arith.truncf %83 : vector<8x8x8xf32> to vector<8x8x8xbf16>
    "tpu.trace_start"() <{level = 10 : i32, message = "hqk,hkc->hqc"}> : () -> ()
    %cst_13 = arith.constant dense<0.000000e+00> : vector<8x8x16xf32>
    %85 = tpu.matmul %84, %68, %cst_13 {dimension_numbers = #tpu.dot_dimension_numbers<[2], [1], [1], [2], [0, 0, 0, 1, 1, 2], [0], [0]>} : vector<8x8x8xbf16>, vector<8x8x16xbf16>, vector<8x8x16xf32> -> vector<8x8x16xf32>
    "tpu.trace_stop"() : () -> ()
    %86 = vector.extract_strided_slice %85 {offsets = [0, 0, 0], sizes = [1, 8, 16], strides = [1, 1, 1]} : vector<8x8x16xf32> to vector<1x8x16xf32>
    %87 = vector.shape_cast %86 : vector<1x8x16xf32> to vector<8x16xf32>
    %88 = arith.truncf %87 : vector<8x16xf32> to vector<8x16xbf16>
    %89 = vector.extract_strided_slice %85 {offsets = [1, 0, 0], sizes = [1, 8, 16], strides = [1, 1, 1]} : vector<8x8x16xf32> to vector<1x8x16xf32>
    %90 = vector.shape_cast %89 : vector<1x8x16xf32> to vector<8x16xf32>
    %91 = arith.truncf %90 : vector<8x16xf32> to vector<8x16xbf16>
    %92 = vector.extract_strided_slice %85 {offsets = [2, 0, 0], sizes = [1, 8, 16], strides = [1, 1, 1]} : vector<8x8x16xf32> to vector<1x8x16xf32>
    %93 = vector.shape_cast %92 : vector<1x8x16xf32> to vector<8x16xf32>
    %94 = arith.truncf %93 : vector<8x16xf32> to vector<8x16xbf16>
    %95 = vector.extract_strided_slice %85 {offsets = [3, 0, 0], sizes = [1, 8, 16], strides = [1, 1, 1]} : vector<8x8x16xf32> to vector<1x8x16xf32>
    %96 = vector.shape_cast %95 : vector<1x8x16xf32> to vector<8x16xf32>
    %97 = arith.truncf %96 : vector<8x16xf32> to vector<8x16xbf16>
    %98 = vector.extract_strided_slice %85 {offsets = [4, 0, 0], sizes = [1, 8, 16], strides = [1, 1, 1]} : vector<8x8x16xf32> to vector<1x8x16xf32>
    %99 = vector.shape_cast %98 : vector<1x8x16xf32> to vector<8x16xf32>
    %100 = arith.truncf %99 : vector<8x16xf32> to vector<8x16xbf16>
    %101 = vector.extract_strided_slice %85 {offsets = [5, 0, 0], sizes = [1, 8, 16], strides = [1, 1, 1]} : vector<8x8x16xf32> to vector<1x8x16xf32>
    %102 = vector.shape_cast %101 : vector<1x8x16xf32> to vector<8x16xf32>
    %103 = arith.truncf %102 : vector<8x16xf32> to vector<8x16xbf16>
    %104 = vector.extract_strided_slice %85 {offsets = [6, 0, 0], sizes = [1, 8, 16], strides = [1, 1, 1]} : vector<8x8x16xf32> to vector<1x8x16xf32>
    %105 = vector.shape_cast %104 : vector<1x8x16xf32> to vector<8x16xf32>
    %106 = arith.truncf %105 : vector<8x16xf32> to vector<8x16xbf16>
    %107 = vector.extract_strided_slice %85 {offsets = [7, 0, 0], sizes = [1, 8, 16], strides = [1, 1, 1]} : vector<8x8x16xf32> to vector<1x8x16xf32>
    %108 = vector.shape_cast %107 : vector<1x8x16xf32> to vector<8x16xf32>
    %109 = arith.truncf %108 : vector<8x16xf32> to vector<8x16xbf16>
    %110 = tpu.concatenate %88, %91, %94, %97, %100, %103, %106, %109 in 1 : vector<8x16xbf16>, vector<8x16xbf16>, vector<8x16xbf16>, vector<8x16xbf16>, vector<8x16xbf16>, vector<8x16xbf16>, vector<8x16xbf16>, vector<8x16xbf16> -> vector<8x128xbf16>
    %c0_14 = arith.constant 0 : index
    %c0_15 = arith.constant 0 : index
    %c0_16 = arith.constant 0 : index
    %111 = vector.load %arg6[%c0_14, %c0_15, %c0_16] : memref<1x128x128xbf16, #tpu.memory_space<vmem>>, vector<1x128x128xbf16>
    %112 = vector.shape_cast %111 : vector<1x128x128xbf16> to vector<128x128xbf16>
    %cst_17 = arith.constant dense<0.000000e+00> : vector<8x128xf32>
    %113 = tpu.matmul %110, %112, %cst_17 {dimension_numbers = #tpu.dot_dimension_numbers<[1], [0], [0], [1], [0, 0, 1, 1], [], []>} : vector<8x128xbf16>, vector<128x128xbf16>, vector<8x128xf32> -> vector<8x128xf32>
    %c0_18 = arith.constant 0 : index
    %c0_19 = arith.constant 0 : index
    %c0_20 = arith.constant 0 : index
    %114 = vector.load %arg7[%c0_18, %c0_19, %c0_20] : memref<1x1x128xf32, #tpu.memory_space<vmem>>, vector<1x1x128xf32>
    %115 = vector.shape_cast %114 : vector<1x1x128xf32> to vector<1x128xf32>
    %116 = vector.broadcast %115 : vector<1x128xf32> to vector<8x128xf32>
    %117 = arith.addf %113, %116 : vector<8x128xf32>
    %118 = arith.addf %3, %117 : vector<8x128xf32>
    %c0_21 = arith.constant 0 : index
    %c0_22 = arith.constant 0 : index
    %c0_23 = arith.constant 0 : index
    %119 = vector.load %arg8[%c0_21, %c0_22, %c0_23] : memref<1x1x128xf32, #tpu.memory_space<vmem>>, vector<1x1x128xf32>
    %120 = vector.shape_cast %119 : vector<1x1x128xf32> to vector<1x128xf32>
    %c0_24 = arith.constant 0 : index
    %c0_25 = arith.constant 0 : index
    %c0_26 = arith.constant 0 : index
    %121 = vector.load %arg9[%c0_24, %c0_25, %c0_26] : memref<1x1x128xf32, #tpu.memory_space<vmem>>, vector<1x1x128xf32>
    %122 = vector.shape_cast %121 : vector<1x1x128xf32> to vector<1x128xf32>
    %cst_27 = arith.constant dense<0.000000e+00> : vector<8xf32>
    %123 = vector.multi_reduction <add>, %118, %cst_27 [1] : vector<8x128xf32> to vector<8xf32>
    %124 = vector.shape_cast %123 : vector<8xf32> to vector<8x1xf32>
    %cst_28 = arith.constant 1.280000e+02 : f32
    %125 = vector.broadcast %cst_28 : f32 to vector<8x1xf32>
    %126 = arith.divf %124, %125 : vector<8x1xf32>
    %127 = vector.broadcast %126 : vector<8x1xf32> to vector<8x128xf32>
    %128 = arith.subf %118, %127 : vector<8x128xf32>
    %129 = arith.mulf %128, %128 : vector<8x128xf32>
    %cst_29 = arith.constant dense<0.000000e+00> : vector<8xf32>
    %130 = vector.multi_reduction <add>, %129, %cst_29 [1] : vector<8x128xf32> to vector<8xf32>
    %131 = vector.shape_cast %130 : vector<8xf32> to vector<8x1xf32>
    %cst_30 = arith.constant 1.280000e+02 : f32
    %132 = vector.broadcast %cst_30 : f32 to vector<8x1xf32>
    %133 = arith.divf %131, %132 : vector<8x1xf32>
    %134 = vector.broadcast %126 : vector<8x1xf32> to vector<8x128xf32>
    %135 = arith.subf %118, %134 : vector<8x128xf32>
    %cst_31 = arith.constant 9.99999974E-6 : f32
    %136 = vector.broadcast %cst_31 : f32 to vector<8x1xf32>
    %137 = arith.addf %133, %136 : vector<8x1xf32>
    %138 = math.rsqrt %137 : vector<8x1xf32>
    %139 = vector.broadcast %138 : vector<8x1xf32> to vector<8x128xf32>
    %140 = arith.mulf %135, %139 : vector<8x128xf32>
    %141 = vector.broadcast %120 : vector<1x128xf32> to vector<8x128xf32>
    %142 = arith.mulf %140, %141 : vector<8x128xf32>
    %143 = vector.broadcast %122 : vector<1x128xf32> to vector<8x128xf32>
    %144 = arith.addf %142, %143 : vector<8x128xf32>
    %145 = arith.truncf %144 : vector<8x128xf32> to vector<8x128xbf16>
    %c0_32 = arith.constant 0 : index
    %c0_33 = arith.constant 0 : index
    %c0_34 = arith.constant 0 : index
    %146 = vector.load %arg12[%c0_32, %c0_33, %c0_34] : memref<1x128x512xbf16, #tpu.memory_space<vmem>>, vector<1x128x512xbf16>
    %147 = vector.shape_cast %146 : vector<1x128x512xbf16> to vector<128x512xbf16>
    %cst_35 = arith.constant dense<0.000000e+00> : vector<8x512xf32>
    %148 = tpu.matmul %145, %147, %cst_35 {dimension_numbers = #tpu.dot_dimension_numbers<[1], [0], [0], [1], [0, 0, 1, 1], [], []>} : vector<8x128xbf16>, vector<128x512xbf16>, vector<8x512xf32> -> vector<8x512xf32>
    %c0_36 = arith.constant 0 : index
    %c0_37 = arith.constant 0 : index
    %c0_38 = arith.constant 0 : index
    %149 = vector.load %arg13[%c0_36, %c0_37, %c0_38] : memref<1x1x512xf32, #tpu.memory_space<vmem>>, vector<1x1x512xf32>
    %150 = vector.shape_cast %149 : vector<1x1x512xf32> to vector<1x512xf32>
    %151 = vector.broadcast %150 : vector<1x512xf32> to vector<8x512xf32>
    %152 = arith.addf %148, %151 : vector<8x512xf32>
    %cst_39 = arith.constant 0.000000e+00 : f32
    %153 = vector.broadcast %cst_39 : f32 to vector<8x512xf32>
    %154 = arith.maximumf %152, %153 : vector<8x512xf32>
    %155 = arith.truncf %154 : vector<8x512xf32> to vector<8x512xbf16>
    %c0_40 = arith.constant 0 : index
    %c0_41 = arith.constant 0 : index
    %c0_42 = arith.constant 0 : index
    %156 = vector.load %arg14[%c0_40, %c0_41, %c0_42] : memref<1x512x128xbf16, #tpu.memory_space<vmem>>, vector<1x512x128xbf16>
    %157 = vector.shape_cast %156 : vector<1x512x128xbf16> to vector<512x128xbf16>
    %cst_43 = arith.constant dense<0.000000e+00> : vector<8x128xf32>
    %158 = tpu.matmul %155, %157, %cst_43 {dimension_numbers = #tpu.dot_dimension_numbers<[1], [0], [0], [1], [0, 0, 1, 1], [], []>} : vector<8x512xbf16>, vector<512x128xbf16>, vector<8x128xf32> -> vector<8x128xf32>
    %c0_44 = arith.constant 0 : index
    %c0_45 = arith.constant 0 : index
    %c0_46 = arith.constant 0 : index
    %159 = vector.load %arg15[%c0_44, %c0_45, %c0_46] : memref<1x1x128xf32, #tpu.memory_space<vmem>>, vector<1x1x128xf32>
    %160 = vector.shape_cast %159 : vector<1x1x128xf32> to vector<1x128xf32>
    %161 = vector.broadcast %160 : vector<1x128xf32> to vector<8x128xf32>
    %162 = arith.addf %158, %161 : vector<8x128xf32>
    %163 = arith.addf %144, %162 : vector<8x128xf32>
    %c0_47 = arith.constant 0 : index
    %c0_48 = arith.constant 0 : index
    %c0_49 = arith.constant 0 : index
    %164 = vector.load %arg10[%c0_47, %c0_48, %c0_49] : memref<1x1x128xf32, #tpu.memory_space<vmem>>, vector<1x1x128xf32>
    %165 = vector.shape_cast %164 : vector<1x1x128xf32> to vector<1x128xf32>
    %c0_50 = arith.constant 0 : index
    %c0_51 = arith.constant 0 : index
    %c0_52 = arith.constant 0 : index
    %166 = vector.load %arg11[%c0_50, %c0_51, %c0_52] : memref<1x1x128xf32, #tpu.memory_space<vmem>>, vector<1x1x128xf32>
    %167 = vector.shape_cast %166 : vector<1x1x128xf32> to vector<1x128xf32>
    %cst_53 = arith.constant dense<0.000000e+00> : vector<8xf32>
    %168 = vector.multi_reduction <add>, %163, %cst_53 [1] : vector<8x128xf32> to vector<8xf32>
    %169 = vector.shape_cast %168 : vector<8xf32> to vector<8x1xf32>
    %cst_54 = arith.constant 1.280000e+02 : f32
    %170 = vector.broadcast %cst_54 : f32 to vector<8x1xf32>
    %171 = arith.divf %169, %170 : vector<8x1xf32>
    %172 = vector.broadcast %171 : vector<8x1xf32> to vector<8x128xf32>
    %173 = arith.subf %163, %172 : vector<8x128xf32>
    %174 = arith.mulf %173, %173 : vector<8x128xf32>
    %cst_55 = arith.constant dense<0.000000e+00> : vector<8xf32>
    %175 = vector.multi_reduction <add>, %174, %cst_55 [1] : vector<8x128xf32> to vector<8xf32>
    %176 = vector.shape_cast %175 : vector<8xf32> to vector<8x1xf32>
    %cst_56 = arith.constant 1.280000e+02 : f32
    %177 = vector.broadcast %cst_56 : f32 to vector<8x1xf32>
    %178 = arith.divf %176, %177 : vector<8x1xf32>
    %179 = vector.broadcast %171 : vector<8x1xf32> to vector<8x128xf32>
    %180 = arith.subf %163, %179 : vector<8x128xf32>
    %cst_57 = arith.constant 9.99999974E-6 : f32
    %181 = vector.broadcast %cst_57 : f32 to vector<8x1xf32>
    %182 = arith.addf %178, %181 : vector<8x1xf32>
    %183 = math.rsqrt %182 : vector<8x1xf32>
    %184 = vector.broadcast %183 : vector<8x1xf32> to vector<8x128xf32>
    %185 = arith.mulf %180, %184 : vector<8x128xf32>
    %186 = vector.broadcast %165 : vector<1x128xf32> to vector<8x128xf32>
    %187 = arith.mulf %185, %186 : vector<8x128xf32>
    %188 = vector.broadcast %167 : vector<1x128xf32> to vector<8x128xf32>
    %189 = arith.addf %187, %188 : vector<8x128xf32>
    %c0_58 = arith.constant 0 : index
    %c0_59 = arith.constant 0 : index
    %190 = vector.load %arg17[%c0_58, %c0_59] : memref<8x128xf32, #tpu.memory_space<vmem>>, vector<8x128xf32>
    tpu.vector_store %arg17[%c0_58, %c0_59], %189 {strides = array<i32>} : memref<8x128xf32, #tpu.memory_space<vmem>>, vector<8x128xf32>,
    %c1_i32 = arith.constant 1 : i32
    %191 = arith.cmpi eq, %arg1, %c1_i32 : i32
    %192 = arith.extui %191 : i1 to i32
    %c0_i32_60 = arith.constant 0 : i32
    %193 = arith.cmpi ne, %192, %c0_i32_60 : i32
    scf.if %193 {
      %c0_61 = arith.constant 0 : index
      %c0_62 = arith.constant 0 : index
      %c0_63 = arith.constant 0 : index
      %194 = vector.load %arg16[%c0_61, %c0_62, %c0_63] : memref<1x8x128xf32, #tpu.memory_space<vmem>>, vector<1x8x128xf32>
      %195 = vector.shape_cast %194 : vector<1x8x128xf32> to vector<8x128xf32>
      %196 = vector.shape_cast %189 : vector<8x128xf32> to vector<1x8x128xf32>
      tpu.vector_store %arg16[%c0_61, %c0_62, %c0_63], %196 {strides = array<i32>} : memref<1x8x128xf32, #tpu.memory_space<vmem>>, vector<1x8x128xf32>,
    } else {
    }
    return
  }
  func.func @transform_0(%arg0: i32, %arg1: i32) -> (i32, i32, i32) {
    %c0_i32 = arith.constant 0 : i32
    %c0_i32_0 = arith.constant 0 : i32
    %c0_i32_1 = arith.constant 0 : i32
    return %arg0, %c0_i32, %c0_i32_0 : i32, i32, i32
  }
  func.func @transform_1(%arg0: i32, %arg1: i32) -> (i32, i32) {
    %c0_i32 = arith.constant 0 : i32
    %c0_i32_0 = arith.constant 0 : i32
    %c0_i32_1 = arith.constant 0 : i32
    return %c0_i32, %c0_i32_0 : i32, i32
  }
  func.func @transform_2(%arg0: i32, %arg1: i32) -> (i32, i32, i32) {
    %c0_i32 = arith.constant 0 : i32
    %c0_i32_0 = arith.constant 0 : i32
    %c0_i32_1 = arith.constant 0 : i32
    return %arg1, %c0_i32, %c0_i32_0 : i32, i32, i32
  }
  func.func @transform_3(%arg0: i32, %arg1: i32) -> (i32, i32, i32) {
    %c0_i32 = arith.constant 0 : i32
    %c0_i32_0 = arith.constant 0 : i32
    %c0_i32_1 = arith.constant 0 : i32
    return %arg1, %c0_i32, %c0_i32_0 : i32, i32, i32
  }
  func.func @transform_4(%arg0: i32, %arg1: i32) -> (i32, i32, i32) {
    %c0_i32 = arith.constant 0 : i32
    %c0_i32_0 = arith.constant 0 : i32
    %c0_i32_1 = arith.constant 0 : i32
    return %arg1, %c0_i32, %c0_i32_0 : i32, i32, i32
  }
  func.func @transform_5(%arg0: i32, %arg1: i32) -> (i32, i32, i32) {
    %c0_i32 = arith.constant 0 : i32
    %c0_i32_0 = arith.constant 0 : i32
    %c0_i32_1 = arith.constant 0 : i32
    return %arg1, %c0_i32, %c0_i32_0 : i32, i32, i32
  }
  func.func @transform_6(%arg0: i32, %arg1: i32) -> (i32, i32, i32) {
    %c0_i32 = arith.constant 0 : i32
    %c0_i32_0 = arith.constant 0 : i32
    %c0_i32_1 = arith.constant 0 : i32
    return %arg1, %c0_i32, %c0_i32_0 : i32, i32, i32
  }
  func.func @transform_7(%arg0: i32, %arg1: i32) -> (i32, i32, i32) {
    %c0_i32 = arith.constant 0 : i32
    %c0_i32_0 = arith.constant 0 : i32
    %c0_i32_1 = arith.constant 0 : i32
    return %arg1, %c0_i32, %c0_i32_0 : i32, i32, i32
  }
  func.func @transform_8(%arg0: i32, %arg1: i32) -> (i32, i32, i32) {
    %c0_i32 = arith.constant 0 : i32
    %c0_i32_0 = arith.constant 0 : i32
    %c0_i32_1 = arith.constant 0 : i32
    return %arg1, %c0_i32, %c0_i32_0 : i32, i32, i32
  }
  func.func @transform_9(%arg0: i32, %arg1: i32) -> (i32, i32, i32) {
    %c0_i32 = arith.constant 0 : i32
    %c0_i32_0 = arith.constant 0 : i32
    %c0_i32_1 = arith.constant 0 : i32
    return %arg1, %c0_i32, %c0_i32_0 : i32, i32, i32
  }
  func.func @transform_10(%arg0: i32, %arg1: i32) -> (i32, i32, i32) {
    %c0_i32 = arith.constant 0 : i32
    %c0_i32_0 = arith.constant 0 : i32
    %c0_i32_1 = arith.constant 0 : i32
    return %arg1, %c0_i32, %c0_i32_0 : i32, i32, i32
  }
  func.func @transform_11(%arg0: i32, %arg1: i32) -> (i32, i32, i32) {
    %c0_i32 = arith.constant 0 : i32
    %c0_i32_0 = arith.constant 0 : i32
    %c0_i32_1 = arith.constant 0 : i32
    return %arg1, %c0_i32, %c0_i32_0 : i32, i32, i32
  }
  func.func @transform_12(%arg0: i32, %arg1: i32) -> (i32, i32, i32) {
    %c0_i32 = arith.constant 0 : i32
    %c0_i32_0 = arith.constant 0 : i32
    %c0_i32_1 = arith.constant 0 : i32
    return %arg1, %c0_i32, %c0_i32_0 : i32, i32, i32
  }
  func.func @transform_13(%arg0: i32, %arg1: i32) -> (i32, i32, i32) {
    %c0_i32 = arith.constant 0 : i32
    %c0_i32_0 = arith.constant 0 : i32
    %c0_i32_1 = arith.constant 0 : i32
    return %arg1, %c0_i32, %c0_i32_0 : i32, i32, i32
  }
  func.func @transform_14(%arg0: i32, %arg1: i32) -> (i32, i32, i32) {
    %c0_i32 = arith.constant 0 : i32
    %c0_i32_0 = arith.constant 0 : i32
    %c0_i32_1 = arith.constant 0 : i32
    return %arg0, %c0_i32, %c0_i32_0 : i32, i32, i32
  }
}

</mosaic_0001>

<bundles_post_ra>
// kernel: tpu_custom_call.1
= control target key start
LH: loop header
LB: loop body
LE: loop exit
PB: predicated region body
PF: predicated region fallthrough
CT: control target
= control target key end

     0   :  { %s4986_s0 = inlined_call_operand.hbm [shape: f32[2,8,128], index: 0, kind: input, shape index: {}]   ;;  %s4987_s1 = inlined_call_operand.hbm [shape: f32[8,8], index: 1, kind: input, shape index: {}]   ;;  %s4988_s2 = inlined_call_operand.hbm [shape: bf16[2,128,384], index: 2, kind: input, shape index: {}]   ;;  %s4989_s3 = inlined_call_operand.hbm [shape: f32[2,1,384], index: 3, kind: input, shape index: {}]   ;;  %s4990_s4 = inlined_call_operand.hbm [shape: bf16[2,128,128], index: 4, kind: input, shape index: {}]   ;;  %s4991_s5 = inlined_call_operand.vmem [shape: f32[2,1,128], index: 5, kind: input, shape index: {}]   ;;  %s4992_s6 = inlined_call_operand.vmem [shape: f32[2,1,128], index: 6, kind: input, shape index: {}]   ;;  %s4993_s7 = inlined_call_operand.vmem [shape: f32[2,1,128], index: 7, kind: input, shape index: {}]   ;;  %s4994_s8 = inlined_call_operand.vmem [shape: f32[2,1,128], index: 8, kind: input, shape index: {}]   ;;  %s4995_s9 = inlined_call_operand.hbm [shape: f32[2,1,128], index: 9, kind: input, shape index: {}]   ;;  %s4996_s10 = inlined_call_operand.hbm [shape: bf16[2,128,512], index: 10, kind: input, shape index: {}]   ;;  %s4997_s11 = inlined_call_operand.vmem [shape: f32[2,1,512], index: 11, kind: input, shape index: {}]   ;;  %s4998_s12 = inlined_call_operand.hbm [shape: bf16[2,512,128], index: 12, kind: input, shape index: {}]   ;;  %s4999_s13 = inlined_call_operand.vmem [shape: f32[2,1,128], index: 13, kind: input, shape index: {}]   ;;  %s5000_s14 = inlined_call_operand.hbm [shape: f32[2,8,128], index: 14, kind: output, shape index: {}]  }
   0x1   :  { %5024 = sst [smem:[#allocation34_spill]] %s4986_s0 }
   0x2   :  { %5025 = sst [smem:[#allocation35_spill]] %s4987_s1 }
   0x3   :  { %5026 = sst [smem:[#allocation36_spill]] %s4988_s2 }
   0x4   :  { %5027 = sst [smem:[#allocation37_spill]] %s4989_s3 }
   0x5   :  { %5028 = sst [smem:[#allocation38_spill]] %s4990_s4 }
   0x6   :  { %5029 = sst [smem:[#allocation39_spill]] %s4991_s5 }
   0x7   :  { %5030 = sst [smem:[#allocation40_spill]] %s4992_s6 }
   0x8   :  { %5031 = sst [smem:[#allocation41_spill]] %s4993_s7 }
   0x9   :  { %5032 = sst [smem:[#allocation42_spill]] %s4994_s8 }
   0xa   :  { %5033 = sst [smem:[#allocation43_spill]] %s4995_s9 }
   0xb   :  { %5034 = sst [smem:[#allocation44_spill]] %s4996_s10 }
   0xc   :  { %5035 = sst [smem:[#allocation45_spill]] %s4997_s11 }
   0xd   :  { %5036 = sst [smem:[#allocation46_spill]] %s4998_s12 }
   0xe   :  { %5037 = sst [smem:[#allocation47_spill]] %s4999_s13 }
   0xf   :  { %5038 = sst [smem:[#allocation48_spill]] %s5000_s14 }
  0x10   :  { %19 = vsyncpa [#allocation4], 0 }
  0x11   :  { %21 = vsyncpa [#allocation4 + $0x1], 0 }
  0x12   :  { %22 = vsyncpa [#allocation7], 0 }
  0x13   :  { %23 = vsyncpa [#allocation5], 0 }
  0x14   :  { %25 = vsyncpa [#allocation5 + $0x1], 0  ;;  %s4270_s29 = smov 0   ;;  %s4272_s30 = smov 0  }
  0x15   :  { %s4274_s15 = smov 0   ;;  %s4276_s16 = smov 0  }
  0x16   :  { %s4278_s17 = smov 0   ;;  %s4280_s18 = smov 0  }
  0x17   :  { %s4282_s19 = smov 0   ;;  %s4284_s20 = smov 0  }
  0x18   :  { %s4286_s21 = smov 0   ;;  %s4288_s22 = smov 0  }
  0x19   :  { %s4290_s23 = smov 0  }
  0x1a LB: > { %5039 = sst [smem:[#allocation19_spill]] %s4132_s30  ;;  %s40_s24 = sadd.s32 1, %s4160_s21  ;;  %s4168_s23 = sphi %s4290_s23, %s31_s23   ;;  %s4164_s22 = sphi %s4288_s22, %s5112_s22   ;;  %s4160_s21 = sphi %s4286_s21, %s5111_s21   ;;  %s4156_s20 = sphi %s4284_s20, %s5110_s20   ;;  %s4152_s19 = sphi %s4282_s19, %s5109_s19   ;;  %s4148_s18 = sphi %s4280_s18, %s5108_s18   ;;  %s4144_s17 = sphi %s4278_s17, %s5114_s17   ;;  %s4140_s16 = sphi %s4276_s16, %s5113_s16   ;;  %s4136_s15 = sphi %s4274_s15, %s5106_s15   ;;  %s4132_s30 = sphi %s4272_s30, %s5105_s30   ;;  %s4128_s29 = sphi %s4270_s29, %s5104_s29  }
  0x1b   : > { %5040 = sst [smem:[#allocation20_spill]] %s4136_s15  ;;  %s43_s25 = sadd.s32 1, %s4164_s22 }
  0x1c   : > { %5041 = sst [smem:[#allocation21_spill]] %s4140_s16  ;;  %p41_p0 = scmp.ge.s32.totalorder %s40_s24, 2 }
  0x1d   : > { %5042 = sst [smem:[#allocation22_spill]] %s4148_s18  ;;  %s50_s26 = sadd.s32 1, %s4148_s18 }
  0x1e   : > { %5043 = sst [smem:[#allocation23_spill]] %s4152_s19  ;;  %p57_p1 = scmp.ne.s32.totalorder %s4148_s18, %s4144_s17 }
  0x1f   : > { %5044 = sst [smem:[#allocation24_spill]] %s4156_s20  ;;  %p58_p2 = scmp.eq.s32.totalorder %s4168_s23, 0 }
  0x20   : > { %5045 = sst [smem:[#allocation25_spill]] %s4160_s21  ;;  %s5116_s24 = smov (%p41_p0, %s40_s24), 0 }
  0x21   : > { %5046 = sst [smem:[#allocation26_spill]] %s4164_s22  ;;  %s5118_s25 = smov (!%p41_p0, %s43_s25), %s4164_s22 }
  0x22   : > { %5047 = sst [smem:[#allocation27_spill]] %s4168_s23  ;;  %p4337_p3 = por %p58_p2, %p57_p1 }
  0x23   : > { %5048 = sst [smem:[#allocation28_spill]] %s5116_s24  ;;  %s94_s28 = ssub.s32 %s4160_s21, %s5116_s24 }
  0x24   : > { %p45_p4 = scmp.ge.s32.totalorder %s5118_s25, 2  ;;  %p95_p5 = scmp.eq.s32.totalorder %s94_s28, 0 }
  0x25   : > { %s97_s14 = sadd.s32 1, %s4136_s15  ;;  %p104_p6 = scmp.ne.s32.totalorder %s4136_s15, %s4132_s30 }
  0x26   : > { %s5120_s25 = smov (%p45_p4, %s5118_s25), 0  ;;  %p3553_p9 = scmp.lt.s32.totalorder %s4168_s23, 4 }
  0x27   : > { %5050 = sst [smem:[#allocation29_spill]] %s5120_s25  ;;  %s47_s11 = ssub.s32 %s4164_s22, %s5120_s25 }
  0x28   : > { %s4349_s20 = scalar_select %p95_p5, %s4136_s15, %s97_s14  }
  0x29   : > { %p4353_p7 = por %p104_p6, %p58_p2  ;;  %p48_p8 = scmp.eq.s32.totalorder %s47_s11, 0 }
  0x2a   : > { %5051 = sst [smem:[#allocation30_spill]] %s4349_s20  ;;  %s457_s24 = sand.u32 1, %s4168_s23  }
  0x2b   : > { %s4360_s8 = scalar_select %p48_p8, %s4148_s18, %s50_s26  }
  0x2c   : > { %s459_s28 = sand.u32 1, %s4148_s18   ;;  %s3118_s6 = sshll.u32 %s4164_s22, 7 }
  0x2d   : > { %5053 = sst [smem:[#allocation31_spill]] %s4360_s8  ;;  %s3117_s7 = sshll.u32 %s459_s28, 3 }
  0x2e   : > { %s5054_s0 = sld [smem:[#allocation34_spill]]  ;;  %s461_s20 = scalar_lea.vmem [#allocation3], %s3117_s7 }
  0x2f   : > { %s468_s1 = sshll.u32 %s461_s20, 4  ;;  %p4369_p10 = pnand %p3553_p9, %p4337_p3  ;;  %s469_s1 = int_to_ptr.vmem [resolvable:$true] %s468_s1 }
  0x30   : > { %p4375_p11 = pnand %p3553_p9, %p4353_p7  ;;  %s4380_s26 = sand.u32 1, %s4136_s15  }
  0x31   : > { %s4382_s28 = scalar_lea.sflag [#allocation4], %s457_s24  ;;  %p3820_p12 = pneg %p4369_p10 }
  0x32   : > { %s3831_s5 = scalar_lea.vmem %s469_s1, 128 }
  0x33   : > { %p3832_p13 = scmp.ne.s32.totalorder %s469_s1, %s3831_s5 }
  0x34   : > { %s466_s14 = scalar_lea.hbm %s5054_s0, %s3118_s6  ;;  %s4170_s6 = smov [#allocation3]  }
  0x35   : > { %p3834_p0 = pnand %p3832_p13, %p3820_p12  ;;  %s3836_s7 = sshll.u32 %s4170_s6, 4  ;;  %s3837_s7 = int_to_ptr.vmem [resolvable:$false] %s3836_s7 }
  0x36   : > { %s3838_s19 = scalar_lea.vmem %s3837_s7, 256  ;;  %p3839_p3 = scmp.lt.s32.totalorder %s469_s1, %s3837_s7 }
  0x37   : > { %p3835_p2 = pneg %p3834_p0  ;;  %p3840_p4 = scmp.lt.s32.totalorder %s3838_s19, %s3831_s5 }
  0x39   : > { %p3841_p5 = por %p3840_p4, %p3839_p3 }
  0x3b   : > { %p3842_p6 = pnand %p3841_p5, %p3835_p2 }
  0x3d   : > { %3845 = shalt.err (!%p3842_p6)
}
  0x3e   : > { %3529 = dma.hbm_to_vmem [thread:$0]  (!%p4369_p10), %s466_s14, 128, %s469_s1, %s4382_s28  }
  0x3f   : > { %s3496_s13 = smul.u32 192, %s4380_s26  ;;  %s5057_s2 = sld [smem:[#allocation36_spill]] }
  0x40   : > { %s3497_s20 = smul.u32 3072, %s4160_s21  ;;  %p4397_p7 = pneg %p4375_p11 }
  0x41   : > { %s479_s0 = scalar_lea.vmem [#allocation8], %s3496_s13  ;;  %s3498_s5 = smul.u32 3, %s4380_s26 }
  0x42   : > { %s486_s7 = sshll.u32 %s479_s0, 4  ;;  %s4171_s1 = smov [#allocation8]   ;;  %s487_s7 = int_to_ptr.vmem [resolvable:$true] %s486_s7 }
  0x43   : > { %s3859_s25 = scalar_lea.vmem %s487_s7, 3072  ;;  %s3864_s14 = sshll.u32 %s4171_s1, 4  ;;  %s3865_s14 = int_to_ptr.vmem [resolvable:$false] %s3864_s14 }
  0x44   : > { %p3860_p8 = scmp.ne.s32.totalorder %s487_s7, %s3859_s25  ;;  %s3866_s24 = scalar_lea.vmem %s3865_s14, 6144 }
  0x45   : > { %s485_s6 = scalar_lea.hbm %s5057_s2, %s3497_s20  ;;  %p3867_p12 = scmp.lt.s32.totalorder %s487_s7, %s3865_s14 }
  0x46   : > { %p3862_p9 = pnand %p3860_p8, %p4397_p7  ;;  %p3868_p13 = scmp.lt.s32.totalorder %s3866_s24, %s3859_s25 }
  0x48   : > { %p3863_p10 = pneg %p3862_p9  ;;  %p3869_p0 = por %p3868_p13, %p3867_p12 }
  0x4a   : > { %p3870_p2 = pnand %p3869_p0, %p3863_p10 }
  0x4c   : > { %3873 = shalt.err (!%p3870_p2)
}
  0x4d   : > { %s4172_s0 = smov 192   ;;  %s4173_s13 = smov 12  }
  0x4e   : > { %3532 = dma.hbm_to_vmem [thread:$0]  (!%p4375_p11), %s485_s6, 3072, %s487_s7, %s4382_s28, %s4172_s0, %s4172_s0, %s4173_s13  }
  0x4f   : > { %s3499_s20 = smul.u32 48, %s4160_s21  ;;  %s500_s27 = scalar_lea.vmem [#allocation9], %s3498_s5 }
  0x50   : > { %s508_s2 = sshll.u32 %s500_s27, 4  ;;  %s3121_s1 = sshll.u32 %s4380_s26, 6  ;;  %s509_s2 = int_to_ptr.vmem [resolvable:$true] %s508_s2 }
  0x51   : > { %s5059_s3 = sld [smem:[#allocation37_spill]]  ;;  %s3887_s14 = scalar_lea.vmem %s509_s2, 48 }
  0x52   : > { %p3888_p3 = scmp.ne.s32.totalorder %s509_s2, %s3887_s14  ;;  %s4174_s24 = smov [#allocation9]  }
  0x53   : > { %s3892_s15 = sshll.u32 %s4174_s24, 4  ;;  %s3893_s15 = int_to_ptr.vmem [resolvable:$false] %s3892_s15 }
  0x54   : > { %p3890_p4 = pnand %p3888_p3, %p4397_p7  ;;  %s3894_s12 = scalar_lea.vmem %s3893_s15, 96 }
  0x55   : > { %p3895_p6 = scmp.lt.s32.totalorder %s509_s2, %s3893_s15  ;;  %p3896_p8 = scmp.lt.s32.totalorder %s3894_s12, %s3887_s14 }
  0x56   : > { %p3891_p5 = pneg %p3890_p4 }
  0x57   : > { %s506_s25 = scalar_lea.hbm %s5059_s3, %s3499_s20  ;;  %p3897_p9 = por %p3896_p8, %p3895_p6 }
  0x59   : > { %p3898_p10 = pnand %p3897_p9, %p3891_p5 }
  0x5b   : > { %3901 = shalt.err (!%p3898_p10)
}
  0x5c   : > { %3535 = dma.hbm_to_vmem [thread:$0]  (!%p4375_p11), %s506_s25, 48, %s509_s2, %s4382_s28  }
  0x5d   : > { %s3263_s8 = sshll.u32 %s4160_s21, 10  ;;  %s5060_s4 = sld [smem:[#allocation38_spill]] }
  0x5e   : > { %s519_s5 = scalar_lea.vmem [#allocation10], %s3121_s1  ;;  %s4175_s12 = smov [#allocation10]  }
  0x5f   : > { %s526_s0 = sshll.u32 %s519_s5, 4  ;;  %s3920_s15 = sshll.u32 %s4175_s12, 4  ;;  %s527_s0 = int_to_ptr.vmem [resolvable:$true] %s526_s0  ;;  %s3921_s15 = int_to_ptr.vmem [resolvable:$false] %s3920_s15 }
  0x60   : > { %s3915_s13 = scalar_lea.vmem %s527_s0, 1024  ;;  %s3922_s20 = scalar_lea.vmem %s3921_s15, 2048 }
  0x61   : > { %p3916_p12 = scmp.ne.s32.totalorder %s527_s0, %s3915_s13  ;;  %p3923_p2 = scmp.lt.s32.totalorder %s527_s0, %s3921_s15 }
  0x62   : > { %p3924_p3 = scmp.lt.s32.totalorder %s3922_s20, %s3915_s13 }
  0x63   : > { %s525_s7 = scalar_lea.hbm %s5060_s4, %s3263_s8  ;;  %p3918_p13 = pnand %p3916_p12, %p4397_p7 }
  0x64   : > { %p3925_p4 = por %p3924_p3, %p3923_p2 }
  0x65   : > { %p3919_p0 = pneg %p3918_p13 }
  0x67   : > { %p3926_p5 = pnand %p3925_p4, %p3919_p0 }
  0x69   : > { %3929 = shalt.err (!%p3926_p5)
}
  0x6a   : > { %s5008_s2 = smov 64   ;;  %s5009_s27 = smov 4  }
  0x6b   : > { %3538 = dma.hbm_to_vmem [thread:$0]  (!%p4375_p11), %s525_s7, 1024, %s527_s0, %s4382_s28, %s5008_s2, %s5008_s2, %s5009_s27  }
  0x6c   : > { %s3124_s1 = sshll.u32 %s4160_s21, 4  ;;  %s563_s25 = scalar_lea.vmem [#allocation11], %s4380_s26 }
  0x6d   : > { %s570_s14 = sshll.u32 %s563_s25, 4  ;;  %s5061_s9 = sld [smem:[#allocation43_spill]]  ;;  %s571_s14 = int_to_ptr.vmem [resolvable:$true] %s570_s14 }
  0x6e   : > { %s3943_s6 = scalar_lea.vmem %s571_s14, 16  ;;  %s4178_s5 = smov [#allocation11]  }
  0x6f   : > { %p3944_p6 = scmp.ne.s32.totalorder %s571_s14, %s3943_s6  ;;  %s3948_s13 = sshll.u32 %s4178_s5, 4  ;;  %s3949_s13 = int_to_ptr.vmem [resolvable:$false] %s3948_s13 }
  0x70   : > { %s3950_s12 = scalar_lea.vmem %s3949_s13, 32  ;;  %p3951_p10 = scmp.lt.s32.totalorder %s571_s14, %s3949_s13 }
  0x71   : > { %p3946_p8 = pnand %p3944_p6, %p4397_p7  ;;  %p3952_p12 = scmp.lt.s32.totalorder %s3950_s12, %s3943_s6 }
  0x73   : > { %s568_s22 = scalar_lea.hbm %s5061_s9, %s3124_s1  ;;  %p3947_p9 = pneg %p3946_p8 }
  0x74   : > { %p3953_p13 = por %p3952_p12, %p3951_p10 }
  0x76   : > { %p3954_p0 = pnand %p3953_p13, %p3947_p9 }
  0x78   : > { %3957 = shalt.err (!%p3954_p0)
}
  0x79   : > { %3541 = dma.hbm_to_vmem [thread:$0]  (!%p4375_p11), %s568_s22, 16, %s571_s14, %s4382_s28  }
  0x7a   : > { %s3125_s7 = sshll.u32 %s4380_s26, 8  ;;  %s3264_s0 = sshll.u32 %s4160_s21, 12 }
  0x7b   : > { %s5062_s10 = sld [smem:[#allocation44_spill]]  ;;  %s581_s25 = scalar_lea.vmem [#allocation12], %s3125_s7 }
  0x7c   : > { %s588_s24 = sshll.u32 %s581_s25, 4  ;;  %s4179_s6 = smov [#allocation12]   ;;  %s589_s24 = int_to_ptr.vmem [resolvable:$true] %s588_s24 }
  0x7d   : > { %s3971_s8 = scalar_lea.vmem %s589_s24, 4096  ;;  %s3976_s5 = sshll.u32 %s4179_s6, 4  ;;  %s3977_s5 = int_to_ptr.vmem [resolvable:$false] %s3976_s5 }
  0x7e   : > { %p3972_p2 = scmp.ne.s32.totalorder %s589_s24, %s3971_s8  ;;  %s3978_s14 = scalar_lea.vmem %s3977_s5, 8192 }
  0x7f   : > { %p3979_p5 = scmp.lt.s32.totalorder %s589_s24, %s3977_s5  ;;  %p3980_p6 = scmp.lt.s32.totalorder %s3978_s14, %s3971_s8 }
  0x80   : > { %p3974_p3 = pnand %p3972_p2, %p4397_p7 }
  0x81   : > { %s587_s1 = scalar_lea.hbm %s5062_s10, %s3264_s0  ;;  %p3981_p8 = por %p3980_p6, %p3979_p5 }
  0x82   : > { %p3975_p4 = pneg %p3974_p3 }
  0x84   : > { %p3982_p9 = pnand %p3981_p8, %p3975_p4 }
  0x86   : > { %3985 = shalt.err (!%p3982_p9)
}
  0x87   : > { %s4180_s22 = smov 256   ;;  %s4181_s13 = smov 16  }
  0x88   : > { %3544 = dma.hbm_to_vmem [thread:$0]  (!%p4375_p11), %s587_s1, 4096, %s589_s24, %s4382_s28, %s4180_s22, %s4180_s22, %s4181_s13  }
  0x89   : > { %s4453_s12 = sadd.s32 4294967295, %s4168_s23   ;;  %s3113_s15 = sadd.s32 4294967294, %s4168_s23  }
  0x8a   : > { %p63_p10 = scmp.ne.s32.totalorder %s4144_s17, %s4140_s16  ;;  %p5011_p12 = scmp.eq.s32.totalorder %s4453_s12, 0 }
  0x8b   : > { %p110_p13 = scmp.ne.s32.totalorder %s4132_s30, %s4128_s29  ;;  %p420_p0 = scmp.eq.s32.totalorder %s4453_s12, 3 }
  0x8c   : > { %p4464_p2 = por %p5011_p12, %p63_p10  ;;  %p426_p3 = scmp.eq.s32.totalorder %s3113_s15, 3 }
  0x8d   : > { %p4470_p4 = por %p110_p13, %p5011_p12  ;;  %p4477_p5 = por %p420_p0, %p57_p1 }
  0x8e   : > { %s5063_s20 = scalar_select %p4464_p2, 1, 0 }
  0x8f   : > { %s5064_s1 = scalar_select %p4470_p4, 1, 0 }
  0x90   : > { %s5065_s25 = scalar_select %p4477_p5, 1, 0 }
  0x91   : > { %p4481_p6 = por %p426_p3, %p63_p10  ;;  %p3114_p8 = scmp.ge.s32.totalorder %s4168_s23, 1 }
  0x92   : > { %5066 = sst [smem:[#allocation32_spill]] %s5065_s25  ;;  %p433_p9 = scmp.lt.s32.totalorder %s4168_s23, 5 }
  0x93   : > { %s5067_s29 = scalar_select %p4481_p6, 1, 0 }
  0x94   : > { %p4487_p2 = pnand %p3114_p8, %p433_p9  ;;  %s4182_s8 = smov [#allocation6]  }
  0x95   : > { %5068 = sst [smem:[#allocation33_spill]] %s5067_s29  ;;  %s446_s6 = sshll.u32 %s4182_s8, 4  ;;  %s447_s6 = int_to_ptr.vmem [resolvable:$true] %s446_s6 }
  0x96   : > { %s5069_s24 = scalar_select %p4487_p2, 1, 0 }
  0x97   : > { %s5070_s22 = sld [smem:[#allocation46_spill]]  ;;  %p3522_p1 = pneg %p4487_p2 }
  0x98   : > { %s609_s15 = scalar_lea.vmem [#allocation13], %s3125_s7  ;;  %s4183_s8 = smov [#allocation13]  }
  0x99   : > { %s616_s2 = sshll.u32 %s609_s15, 4  ;;  %p4502_p10 = pnand %p3522_p1, %p5011_p12  ;;  %s617_s2 = int_to_ptr.vmem [resolvable:$true] %s616_s2 }
  0x9a   : > { %s3999_s3 = scalar_lea.vmem %s617_s2, 4096  ;;  %s4004_s5 = sshll.u32 %s4183_s8, 4  ;;  %s4005_s5 = int_to_ptr.vmem [resolvable:$false] %s4004_s5 }
  0x9b   : > { %p4000_p13 = scmp.ne.s32.totalorder %s617_s2, %s3999_s3  ;;  %p4007_p8 = scmp.lt.s32.totalorder %s617_s2, %s4005_s5 }
  0x9d   : > { %s615_s13 = scalar_lea.hbm %s5070_s22, %s3264_s0  ;;  %p4002_p0 = pnand %p4000_p13, %p4397_p7 }
  0x9e   : > { %s4006_s0 = scalar_lea.vmem %s4005_s5, 8192 }
  0x9f   : > { %p4003_p3 = pneg %p4002_p0  ;;  %p4008_p9 = scmp.lt.s32.totalorder %s4006_s0, %s3999_s3 }
  0xa1   : > { %p4009_p6 = por %p4008_p9, %p4007_p8 }
  0xa3   : > { %p4010_p5 = pnand %p4009_p6, %p4003_p3 }
  0xa5   : > { %4013 = shalt.err (!%p4010_p5)
}
  0xa6   : > { %s5072_s26 = smov 4   ;;  %s5073_s7 = smov 64  }
  0xa7   : > { %3547 = dma.hbm_to_vmem [thread:$0]  (!%p4375_p11), %s615_s13, 4096, %s617_s2, %s4382_s28, %s5073_s7, %s5073_s7, %s5072_s26  }
  0xa8   : > { %p4016_p7 = pneg %p4502_p10  ;;  %s4025_s19 = scalar_lea.vmem %s447_s6, 128 }
  0xa9   : > { %p4026_p1 = scmp.ne.s32.totalorder %s447_s6, %s4025_s19  ;;  %p4033_p12 = scmp.lt.s32.totalorder %s447_s6, %s447_s6 }
  0xaa   : > { %p4034_p4 = scmp.lt.s32.totalorder %s4025_s19, %s4025_s19 }
  0xab   : > { %p4028_p13 = pnand %p4026_p1, %p4016_p7 }
  0xac   : > { %p4035_p2 = por %p4034_p4, %p4033_p12 }
  0xad   : > { %p4029_p0 = pneg %p4028_p13 }
  0xaf   : > { %p4036_p8 = pnand %p4035_p2, %p4029_p0 }
  0xb1   : > { %4039 = shalt.err (!%p4036_p8)
}
  0xb2   : > { %s5074_s14 = sld [smem:[#allocation35_spill]]  ;;  %p5075_p5 = scmp.ne.s32.totalorder %s5069_s24, 0 }
  0xb3   : > { %s636_s28 = sand.u32 (!%p5075_p5), 1, %s4453_s12   ;;  %s5014_s2 = sand.u32 (!%p5075_p5), 1, %s4144_s17  }
  0xb4   : > { %634 = sbr.rel (%p5075_p5) target bundleno = 2709 (0xa95), region = 76  ;;  %s4527_s22 = sshll.u32 (!%p5075_p5), %s5014_s2, 3 }
  0xb5   : > { %s637_s13 = scalar_lea.sflag (!%p5075_p5), [#allocation4], %s636_s28  ;;  %s640_s15 = scalar_lea.vmem (!%p5075_p5), [#allocation3], %s4527_s22 }
  0xb6   : > { %p5076_p11 = scmp.ne.s32.totalorder (!%p5075_p5), %s5063_s20, 0 }
  0xb8   : > { %3525 = dma.hbm_to_vmem [thread:$0]  (!%p4502_p10), %s5074_s14, 128, %s447_s6, [#allocation7]  }
  0xb9   : > { %4111 = dma.done.wait (%p5076_p11), %s637_s13, 128  }
  0xba   : > { %4113 = vsyncadd (%p5076_p11), %s637_s13, 4294967168  ;;  %p5077_p12 = scmp.eq.s32.totalorder %s4453_s12, 0 }
  0xbc   : > { %4115 = dma.done.wait (%p5077_p12), [#allocation7], 128   ;;  %p5078_p2 = pmov %p5077_p12 }
  0xbd   : > { %s4539_s27 = sand.u32 1, %s4132_s30   ;;  %p5079_p4 = scmp.ne.s32.totalorder %s5064_s1, 0 }
  0xbe   : > { %4117 = vsyncadd (%p5078_p2), [#allocation7], 4294967168  ;;  %s3500_s24 = smul.u32 192, %s4539_s27 }
  0xc0   : > { %s4542_s6 = scalar_lea.vmem [#allocation8], %s3500_s24 }
  0xc1   : > { %4119 = dma.done.wait (%p5079_p4), %s637_s13, 12352  }
  0xc2   : > { %4121 = vsyncadd (%p5079_p4), %s637_s13, 4294954944  ;;  %s5080_s20 = sld [smem:[#allocation23_spill]]  ;;  %s3501_s12 = smul.u32 3, %s4539_s27 }
  0xc3   : > { %s3134_s8 = sshll.u32 %s4539_s27, 6  ;;  %s3135_s5 = sshll.u32 %s4539_s27, 8 }
  0xc4   : > { %s5082_s14 = sld [smem:[#allocation40_spill]]  ;;  %s4581_s3 = scalar_lea.vmem [#allocation9], %s3501_s12 }
  0xc5   : > { %s5083_s2 = sld [smem:[#allocation41_spill]]  ;;  %s4583_s11 = scalar_lea.vmem [#allocation10], %s3134_s8 }
  0xc6   : > { %s5084_s21 = sld [smem:[#allocation42_spill]]  ;;  %s4588_s13 = scalar_lea.vmem [#allocation13], %s3135_s5 }
  0xc7   : > { %s5085_s29 = sld [smem:[#allocation47_spill]]  ;;  %s789_s9 = scalar_lea.vmem [#allocation14], %s4527_s22 }
  0xc8   : > { %p790_p6 = scmp.lt.s32.totalorder %s5080_s20, 1  ;;  %s5086_s19 = sld [smem:[#allocation45_spill]] }
  0xc9   : > { %p3139_p10 = scmp.ne.s32.totalorder %s5080_s20, 0 }
  0xca   : > { %s4553_s0 = scalar_select %p790_p6, %s5080_s20, 1 }
  0xcb   : > { %813 = sbr.rel (%p3139_p10) target bundleno = 210 (0xd2), region = 112 }
  0xcc   : > { %s795_s28 = scalar_lea.vmem %s5082_s14, %s4553_s0  ;;  %s798_s4 = scalar_lea.vmem %s5083_s2, %s4553_s0 }
  0xcd   : > { %s801_s18 = scalar_lea.vmem %s5084_s21, %s4553_s0  ;;  %s3138_s30 = sshll.u32 %s4553_s0, 2 }
  0xce   : > { %s808_s16 = scalar_lea.vmem %s5085_s29, %s4553_s0  ;;  %s4579_s1 = scalar_lea.vmem %s5086_s19, %s3138_s30 }
  0xcf   : > { %s679_s14 = scalar_lea.vmem [#allocation11], %s4539_s27  ;;  %s4586_s2 = scalar_lea.vmem [#allocation12], %s3135_s5 }
  0xd0   : > { %v814_v0 = vld [vmem:[%s640_s15] sm:$0xff] }
  0xd1   : > { %815 = vst [vmem:[#allocation2] sm:$0xff] %v814_v0 }
  0xd2 PF: > { %v3661_v1 = vld [vmem:[%s4542_s6 + $0xac] ss:$12 sps:$4 sm:$0xff]   ;;  %v3663_v2 = vld [vmem:[%s4542_s6 + $0xa8] ss:$12 sps:$4 sm:$0xff]   ;;  %v4184_v3 = vmov 0   ;;  %v4185_v4 = vmov 0.0   ;;  %v852_v29 = vlaneseq }
  0xd3   : > { %1027 = vmatprep.mubr.bf16.mxu0 %v4184_v3  ;;  %3360 = vmatprep.subr.bf16.mxu1 %v4185_v4  ;;  %v3664_v5 = vld [vmem:[%s4542_s6 + $0x94] ss:$12 sps:$4 sm:$0xff]   ;;  %v3666_v6 = vld [vmem:[%s4542_s6 + $0x90] ss:$12 sps:$4 sm:$0xff]   ;;  %v3669_v8 = vld [vmem:[%s4542_s6 + $0x78] ss:$12 sps:$4 sm:$0xff]  }
  0xd4   : > { %995 = vmatprep.subr.bf16.mxu0 %v3661_v1  ;;  %v3667_v7 = vld [vmem:[%s4542_s6 + $0x7c] ss:$12 sps:$4 sm:$0xff]   ;;  %v3670_v9 = vld [vmem:[%s4542_s6 + $0x64] ss:$12 sps:$4 sm:$0xff]   ;;  %v3672_v10 = vld [vmem:[%s4542_s6 + $0x60] ss:$12 sps:$4 sm:$0xff]  }
  0xd5   : > { %996 = vmatpush1.bf16.msra.mxu0 %v3663_v2  ;;  %v3685_v11 = vld [vmem:[%s4542_s6 + $0xb0] ss:$12 sps:$4 sm:$0xff]   ;;  %v3673_v12 = vld [vmem:[%s4542_s6 + $0x4c] ss:$12 sps:$4 sm:$0xff]   ;;  %v3675_v14 = vld [vmem:[%s4542_s6 + $0x48] ss:$12 sps:$4 sm:$0xff]  }
  0xd6   : > { %997 = vmatprep.subr.bf16.mxu0 %v3664_v5  ;;  %3361 = vmatpush3.bf16.msra.mxu1 %v3685_v11  ;;  %v3686_v13 = vld [vmem:[%s4542_s6 + $0x98] ss:$12 sps:$4 sm:$0xff]   ;;  %v3676_v15 = vld [vmem:[%s4542_s6 + $0x34] ss:$12 sps:$4 sm:$0xff]   ;;  %v3678_v16 = vld [vmem:[%s4542_s6 + $0x30] ss:$12 sps:$4 sm:$0xff]  }
  0xd7   : > { %3362 = vmatprep.subr.bf16.mxu1 %v4185_v4  ;;  %v3687_v17 = vld [vmem:[%s4542_s6 + $0x80] ss:$12 sps:$4 sm:$0xff]   ;;  %v3679_v18 = vld [vmem:[%s4542_s6 + $0x1c] ss:$12 sps:$4 sm:$0xff]   ;;  %v3681_v20 = vld [vmem:[%s4542_s6 + $0x18] ss:$12 sps:$4 sm:$0xff]  }
  0xd8   : > { %v3688_v19 = vld [vmem:[%s4542_s6 + $0x68] ss:$12 sps:$4 sm:$0xff]   ;;  %v3682_v21 = vld [vmem:[%s4542_s6 + $0x4] ss:$12 sps:$4 sm:$0xff]   ;;  %v3684_v23 = vld [vmem:[%s4542_s6] ss:$12 sps:$4 sm:$0xff]  }
  0xd9   : > { %998 = vmatpush1.bf16.msra.mxu0 %v3666_v6  ;;  %v3689_v22 = vld [vmem:[%s4542_s6 + $0x50] ss:$12 sps:$4 sm:$0xff]   ;;  %v816_v24 = vld [vmem:[#allocation2] sm:$0xff]  ;;  %v3692_v28 = vld [vmem:[%s4542_s6 + $0x8] ss:$12 sps:$4 sm:$0xff]   ;;  %vm4186_vm0 = vmmov 0  }
  0xda   : > { %999 = vmatprep.subr.bf16.mxu0 %v3667_v7  ;;  %3363 = vmatpush3.bf16.msra.mxu1 %v3686_v13  ;;  %v3690_v25 = vld [vmem:[%s4542_s6 + $0x38] ss:$12 sps:$4 sm:$0xff]   ;;  %v817_v26 = vpack.c.bf16 %v816_v24, %v816_v24  ;;  %v3691_v27 = vld [vmem:[%s4542_s6 + $0x20] ss:$12 sps:$4 sm:$0xff]   ;;  %v4633_v30 = vshrl.u32 %v852_v29, 7  ;;  %vm1125_vm1 = vcmask 130048  }
  0xdb   : > { %3364 = vmatprep.subr.bf16.mxu1 %v4185_v4  ;;  %3376 = vmatprep.mubr.msk.bf16.mxu1 %vm4186_vm0, %v4185_v4  ;;  %v850_v33 = vld [vmem:[%s4581_s3] sm:$0x7]  ;;  %s4187_s10 = smov 96   ;;  %s4188_s30 = smov 112   ;;  %vm1594_vm2 = vcmask 1043456   ;;  %v1124_v13 = vld [vmem:[#allocation6] sm:$0xff] }
  0xdc   : > { %v858_v31 = vsub.s32 1, %v4633_v30  ;;  %v854_v32 = vsub.s32 0, %v4633_v30  ;;  %s4189_s21 = smov 64   ;;  %s4190_s23 = smov 80   ;;  %v862_v45 = vsub.s32 2, %v4633_v30  ;;  %vm1494_vm3 = vcmask 64512  }
  0xdd   : > { %1000 = vmatpush1.bf16.msra.mxu0 %v3669_v8  ;;  %s4191_s25 = smov 48   ;;  %s4192_s29 = smov 32   ;;  %vm1992_vm4 = vcmask 261120   ;;  %vm1995_vm5 = vcmask 392192   ;;  %vm1998_vm6 = vcmask 523264   ;;  %vm2001_vm7 = vcmask 654336  }
  0xde   : > { %1001 = vmatprep.subr.bf16.mxu0 %v3670_v9  ;;  %3365 = vmatpush3.bf16.msra.mxu1 %v3687_v17  ;;  %v859_v34 = vrot.slane %v850_v33, %v858_v31  ;;  %v855_v36 = vrot.slane %v850_v33, %v854_v32  ;;  %s4193_s15 = smov 16   ;;  %v863_v46 = vrot.slane %v850_v33, %v862_v45  ;;  %vm2004_vm8 = vcmask 785408   ;;  %s5087_s12 = sld [smem:[#allocation39_spill]] }
  0xdf   : > { %3366 = vmatprep.subr.bf16.mxu1 %v4185_v4  ;;  %vm2007_vm9 = vcmask 916480  }
  0xe1   : > { %1002 = vmatpush1.bf16.msra.mxu0 %v3672_v10 }
  0xe2   : > { %1003 = vmatprep.subr.bf16.mxu0 %v3673_v12  ;;  %3367 = vmatpush3.bf16.msra.mxu1 %v3688_v19 }
  0xe3   : > { %3368 = vmatprep.subr.bf16.mxu1 %v4185_v4 }
  0xe4   : > { %s5088_s8 = scalar_lea.vmem %s5087_s12, %s4553_s0 }
  0xe5   : > { %1004 = vmatpush1.bf16.msra.mxu0 %v3675_v14 }
  0xe6   : > { %1005 = vmatprep.subr.bf16.mxu0 %v3676_v15  ;;  %3369 = vmatpush3.bf16.msra.mxu1 %v3689_v22 }
  0xe7   : > { %3370 = vmatprep.subr.bf16.mxu1 %v4185_v4 }
  0xe9   : > { %1006 = vmatpush1.bf16.msra.mxu0 %v3678_v16 }
  0xea   : > { %1007 = vmatprep.subr.bf16.mxu0 %v3679_v18  ;;  %3371 = vmatpush3.bf16.msra.mxu1 %v3690_v25 }
  0xeb   : > { %3372 = vmatprep.subr.bf16.mxu1 %v4185_v4 }
  0xed   : > { %1008 = vmatpush1.bf16.msra.mxu0 %v3681_v20 }
  0xee   : > { %1009 = vmatprep.subr.bf16.mxu0 %v3682_v21  ;;  %3373 = vmatpush3.bf16.msra.mxu1 %v3691_v27 }
  0xef   : > { %3374 = vmatprep.subr.bf16.mxu1 %v4185_v4 }
  0xf1   : > { %1010 = vmatpush1.bf16.msra.mxu0 %v3684_v23 }
  0xf2   : > { %3404 = vmatprep.subr.bf16.mxu0 %v4185_v4  ;;  %3375 = vmatpush3.bf16.msra.mxu1 %v3692_v28 }
  0xf3   : > { %3380 = vmatprep.subr.bf16.mxu1 %v4185_v4 }
  0xf4   : > { %1028 = vmatmul.mubr.bf16.vlgmr.msra.gmra.mxu0 %v817_v26 }
  0xf5   : > { %3406 = vmatprep.mubr.msk.bf16.mxu0 %vm4186_vm0, %v4185_v4  ;;  %3377 = vmatmul.mubr.bf16.vlgmr.msra.gmra.mxu1 %v817_v26 }
  0xf6   : > { %3382 = vmatprep.mubr.msk.bf16.mxu1 %vm4186_vm0, %v4185_v4 }
 0x1b4   : > { %v1029_v35 = vpop.f32.mrf.mxu0 }
 0x1b5   : > { %v1030_v40 = vadd.f32 %v1029_v35, %v855_v36  ;;  %v1070_v47 = vpop.f32.mrf.mxu1 }
 0x1b6   : > { %v1031_v37 = vpop.f32.mrf.mxu0  ;;  %v1071_v48 = vadd.f32 %v1070_v47, %v863_v46 }
 0x1b7   : > { %v1032_v38 = vadd.f32 %v1031_v37, %v859_v34  ;;  %v1076_v44 = vpack.c.bf16 %v1030_v40, %v1030_v40  ;;  %v3378_v49 = vpop.f32.mrf.mxu1 }
 0x1b8   : > { %v1033_v39 = vpop.f32.mrf.mxu0  ;;  %v4664_v50 = vpack.c.bf16 %v1071_v48, %v1071_v48 }
 0x1b9   : > { %v1077_v41 = vpack.c.bf16 %v1032_v38, %v1032_v38  ;;  %v1073_v51 = vpop.f32.mrf.mxu1 }
 0x1ba   : > { %v1034_v42 = vpop.f32.mrf.mxu0  ;;  %v1596_v8 = vsel %vm1594_vm2, %v4664_v50, 0 }
 0x1bb   : > { %1097 = vrot.lane.b32.xlu1 %v1077_v41, %s4187_s10  ;;  %1095 = vrot.lane.b32.xlu0 %v1077_v41, %s4188_s30  ;;  %v1130_v43 = vsel %vm1125_vm1, %v1077_v41, 0  ;;  %v3379_v52 = vpop.f32.mrf.mxu1 }
 0x1bc   : > { %3381 = vmatpush3.bf16.xpose.msra.mxu1 %v1130_v43 }
 0x1bd   : > { %3386 = vmatprep.subr.bf16.mxu1 %v4185_v4 }
 0x1bf   : > { %1082 = vrot.lane.b32.xlu1 %v1076_v44, %s4187_s10  ;;  %1080 = vrot.lane.b32.xlu0 %v1076_v44, %s4188_s30 }
 0x1c3   : > { %1101 = vrot.lane.b32.xlu1 %v1077_v41, %s4189_s21  ;;  %1099 = vrot.lane.b32.xlu0 %v1077_v41, %s4190_s23 }
 0x1c4   : > { %3383 = vmatmul.mubr.msk.bf16.vlgmr.msra.gmra.mxu1 %vm1125_vm1, %v1076_v44 }
 0x1c5   : > { %3388 = vmatprep.mubr.msk.bf16.mxu1 %vm4186_vm0, %v4185_v4 }
 0x1c7   : > { %1103 = vrot.lane.b32.xlu1 %v1077_v41, %s4191_s25  ;;  %1084 = vrot.lane.b32.xlu0 %v1076_v44, %s4190_s23 }
 0x1cb   : > { %1105 = vrot.lane.b32.xlu1 %v1077_v41, %s4192_s29  ;;  %1086 = vrot.lane.b32.xlu0 %v1076_v44, %s4189_s21 }
 0x1cf   : > { %1107 = vrot.lane.b32.xlu1 %v1077_v41, %s4193_s15  ;;  %1088 = vrot.lane.b32.xlu0 %v1076_v44, %s4191_s25 }
 0x1d3   : > { %1092 = vrot.lane.b32.xlu1 %v1076_v44, %s4193_s15  ;;  %1090 = vrot.lane.b32.xlu0 %v1076_v44, %s4192_s29 }
 0x1d7   : > { %1110 = vrot.lane.b32.xlu1 %v4664_v50, %s4188_s30 }
 0x22d   : > { %v1098_v53 = vpop.permute.xlu1 %1097  ;;  %v1096_v54 = vpop.permute.xlu0 %1095 }
 0x22e   : > { %v1176_v55 = vsel %vm1125_vm1, %v1096_v54, 0  ;;  %v1222_v60 = vsel %vm1125_vm1, %v1098_v53, 0 }
 0x22f   : > { %3387 = vmatpush3.bf16.xpose.msra.mxu1 %v1176_v55 }
 0x230   : > { %3392 = vmatprep.subr.bf16.mxu1 %v4185_v4 }
 0x231   : > { %v1083_v56 = vpop.permute.xlu1 %1082  ;;  %v1081_v57 = vpop.permute.xlu0 %1080 }
 0x235   : > { %v1102_v58 = vpop.permute.xlu1 %1101  ;;  %v1100_v59 = vpop.permute.xlu0 %1099 }
 0x236   : > { %v1314_v61 = vsel %vm1125_vm1, %v1102_v58, 0  ;;  %3389 = vmatmul.mubr.msk.bf16.vlgmr.msra.gmra.mxu1 %vm1125_vm1, %v1081_v57  ;;  %v1268_v2 = vsel %vm1125_vm1, %v1100_v59, 0 }
 0x237   : > { %3393 = vmatpush3.bf16.xpose.msra.mxu1 %v1222_v60  ;;  %3405 = vmatpush3.bf16.xpose.msra.mxu0 %v1314_v61 }
 0x238   : > { %3394 = vmatprep.mubr.msk.bf16.mxu1 %vm4186_vm0, %v4185_v4  ;;  %3398 = vmatprep.subr.bf16.mxu1 %v4185_v4 }
 0x239   : > { %v1104_v62 = vpop.permute.xlu1 %1103  ;;  %v1085_v63 = vpop.permute.xlu0 %1084  ;;  %3416 = vmatprep.subr.bf16.mxu0 %v4185_v4 }
 0x23a   : > { %v1360_v9 = vsel %vm1125_vm1, %v1104_v62, 0 }
 0x23d   : > { %v1106_v0 = vpop.permute.xlu1 %1105  ;;  %v1087_v1 = vpop.permute.xlu0 %1086 }
 0x23e   : > { %v1406_v5 = vsel %vm1125_vm1, %v1106_v0, 0  ;;  %3395 = vmatmul.mubr.msk.bf16.vlgmr.msra.gmra.mxu1 %vm1125_vm1, %v1083_v56  ;;  %3407 = vmatmul.mubr.msk.bf16.vlgmr.msra.gmra.mxu0 %vm1125_vm1, %v1087_v1 }
 0x23f   : > { %3399 = vmatpush3.bf16.xpose.msra.mxu1 %v1268_v2  ;;  %3417 = vmatpush3.bf16.xpose.msra.mxu0 %v1406_v5 }
 0x240   : > { %3418 = vmatprep.mubr.msk.bf16.mxu0 %vm4186_vm0, %v4185_v4  ;;  %3400 = vmatprep.mubr.msk.bf16.mxu1 %vm4186_vm0, %v4185_v4 }
 0x241   : > { %v1089_v6 = vpop.permute.xlu0 %1088  ;;  %3410 = vmatprep.subr.bf16.mxu1 %v4185_v4  ;;  %3428 = vmatprep.subr.bf16.mxu0 %v4185_v4  ;;  %v1108_v10 = vpop.permute.xlu1 %1107 }
 0x242   : > { %v1452_v11 = vsel %vm1125_vm1, %v1108_v10, 0 }
 0x245   : > { %v1091_v7 = vpop.permute.xlu0 %1090  ;;  %v1093_v12 = vpop.permute.xlu1 %1092 }
 0x246   : > { %3401 = vmatmul.mubr.msk.bf16.vlgmr.msra.gmra.mxu1 %vm1125_vm1, %v1085_v63  ;;  %3419 = vmatmul.mubr.msk.bf16.vlgmr.msra.gmra.mxu0 %vm1125_vm1, %v1091_v7 }
 0x247   : > { %3411 = vmatpush3.bf16.xpose.msra.mxu1 %v1360_v9  ;;  %3412 = vmatprep.mubr.msk.bf16.mxu1 %vm4186_vm0, %v4185_v4 }
 0x248   : > { %3422 = vmatprep.subr.bf16.mxu1 %v4185_v4  ;;  %3429 = vmatpush3.bf16.msra.mxu0 %v1596_v8 }
 0x249   : > { %3430 = vmatprep.mubr.msk.bf16.mxu0 %vm4186_vm0, %v4185_v4  ;;  %3440 = vmatprep.subr.bf16.mxu0 %v4185_v4  ;;  %v1111_v20 = vpop.permute.xlu1 %1110 }
 0x24a   : > { %v1642_v21 = vsel %vm1594_vm2, %v1111_v20, 0 }
 0x24e   : > { %3413 = vmatmul.mubr.msk.bf16.vlgmr.msra.gmra.mxu1 %vm1125_vm1, %v1089_v6 }
 0x24f   : > { %3423 = vmatpush3.bf16.xpose.msra.mxu1 %v1452_v11  ;;  %3424 = vmatprep.mubr.msk.bf16.mxu1 %vm4186_vm0, %v4185_v4 }
 0x250   : > { %3434 = vmatprep.subr.bf16.mxu1 %v4185_v4 }
 0x256   : > { %3425 = vmatmul.mubr.msk.bf16.vlgmr.msra.gmra.mxu1 %vm1125_vm1, %v1093_v12 }
 0x257   : > { %3436 = vmatprep.mubr.msk.bf16.mxu1 %vm4186_vm0, %v4185_v4  ;;  %3435 = vmatpush3.bf16.msra.mxu1 %v1642_v21 }
 0x258   : > { %3446 = vmatprep.subr.bf16.mxu1 %v4185_v4 }
 0x284   : > { %v1166_v14 = vpop.f32.mrf.mxu1 }
 0x285   : > { %v1167_v15 = vadd.f32 %v1166_v14, %v1124_v13 }
 0x286   : > { %v3384_v16 = vpop.f32.mrf.mxu1 }
 0x287   : > { %v1495_v17 = vsel %vm1494_vm3, %v1167_v15, -inf }
 0x288   : > { %1496 = vmax.xlane.f32.xlu0 %v1495_v17  ;;  %v1169_v18 = vpop.f32.mrf.mxu1 }
 0x28a   : > { %v3385_v19 = vpop.f32.mrf.mxu1 }
 0x2f6   : > { %v1212_v22 = vpop.f32.mrf.mxu1 }
 0x2f7   : > { %v1213_v23 = vadd.f32 %v1212_v22, %v1124_v13 }
 0x2f8   : > { %v3390_v24 = vpop.f32.mrf.mxu1 }
 0x2f9   : > { %v1498_v25 = vsel %vm1494_vm3, %v1213_v23, -inf }
 0x2fa   : > { %1499 = vmax.xlane.f32.xlu1 %v1498_v25  ;;  %v1215_v26 = vpop.f32.mrf.mxu1 }
 0x2fc   : > { %v3391_v27 = vpop.f32.mrf.mxu1 }
 0x2fe   : > { %v1258_v28 = vpop.f32.mrf.mxu1  ;;  %v1350_v29 = vpop.f32.mrf.mxu0 }
 0x2ff   : > { %v1259_v33 = vadd.f32 %v1258_v28, %v1124_v13  ;;  %v1351_v34 = vadd.f32 %v1350_v29, %v1124_v13 }
 0x300   : > { %v3396_v35 = vpop.f32.mrf.mxu1  ;;  %v3408_v36 = vpop.f32.mrf.mxu0 }
 0x301   : > { %v1507_v37 = vsel %vm1494_vm3, %v1351_v34, -inf  ;;  %v1501_v38 = vsel %vm1494_vm3, %v1259_v33, -inf }
 0x302   : > { %v1353_v39 = vpop.f32.mrf.mxu0  ;;  %1508 = vmax.xlane.f32.xlu1 %v1507_v37  ;;  %1502 = vmax.xlane.f32.xlu0 %v1501_v38  ;;  %v1261_v40 = vpop.f32.mrf.mxu1 }
 0x304   : > { %v3397_v41 = vpop.f32.mrf.mxu1  ;;  %v3409_v42 = vpop.f32.mrf.mxu0 }
 0x306   : > { %v1304_v43 = vpop.f32.mrf.mxu1  ;;  %v1442_v44 = vpop.f32.mrf.mxu0 }
 0x307   : > { %v1305_v46 = vadd.f32 %v1304_v43, %v1124_v13  ;;  %v4712_v47 = vadd.f32 %v1442_v44, %v1124_v13 }
 0x308   : > { %v3402_v48 = vpop.f32.mrf.mxu1  ;;  %v3420_v49 = vpop.f32.mrf.mxu0 }
 0x309   : > { %v1513_v51 = vsel %vm1494_vm3, %v4712_v47, -inf  ;;  %v1504_v52 = vsel %vm1494_vm3, %v1305_v46, -inf }
 0x30a   : > { %v1445_v53 = vpop.f32.mrf.mxu0  ;;  %1514 = vmax.xlane.f32.xlu1 %v1513_v51  ;;  %1505 = vmax.xlane.f32.xlu0 %v1504_v52  ;;  %v1307_v54 = vpop.f32.mrf.mxu1 }
 0x30c   : > { %v3403_v55 = vpop.f32.mrf.mxu1  ;;  %v3421_v56 = vpop.f32.mrf.mxu0 }
 0x30e   : > { %v1396_v57 = vpop.f32.mrf.mxu1 }
 0x30f   : > { %v1397_v58 = vadd.f32 %v1396_v57, %v1124_v13 }
 0x310   : > { %v3414_v59 = vpop.f32.mrf.mxu1 }
 0x311   : > { %v1510_v60 = vsel %vm1494_vm3, %v1397_v58, -inf  ;;  %v1497_v7 = vpop.xlane.xlu0 %1496 }
 0x312   : > { %1511 = vmax.xlane.f32.xlu0 %v1510_v60  ;;  %v1399_v61 = vpop.f32.mrf.mxu1  ;;  %v1519_v8 = vsub.f32 %v1167_v15, %v1497_v7 }
 0x314   : > { %v3415_v62 = vpop.f32.mrf.mxu1  ;;  %v1527_v9 = vmul.f32 1.442695, %v1519_v8 }
 0x316   : > { %v1488_v63 = vpop.f32.mrf.mxu1  ;;  %3781 = vpow2.f32 %v1527_v9 }
 0x317   : > { %v1489_v0 = vadd.f32 %v1488_v63, %v1124_v13 }
 0x318   : > { %v3426_v1 = vpop.f32.mrf.mxu1 }
 0x319   : > { %v1516_v2 = vsel %vm1494_vm3, %v1489_v0, -inf }
 0x31a   : > { %1517 = vmax.xlane.f32.xlu0 %v1516_v2  ;;  %v1491_v5 = vpop.f32.mrf.mxu1 }
 0x31b   : > { %1114 = vrot.lane.b32.xlu1 %v4664_v50, %s4190_s23 }
 0x31c   : > { %v3427_v6 = vpop.f32.mrf.mxu1 }
 0x323   : > { %v3782_v10 = vpop.eup %3781 }
 0x324   : > { %v1543_v11 = vsel %vm1494_vm3, %v3782_v10, 0.0 }
 0x330   : > { %1112 = vrot.lane.b32.xlu0 %v4664_v50, %s4187_s10 }
 0x33f   : > { %1544 = vadd.xlane.f32.xlu1 %v1543_v11 }
 0x383   : > { %v1500_v12 = vpop.xlane.xlu1 %1499 }
 0x384   : > { %v1520_v13 = vsub.f32 %v1213_v23, %v1500_v12 }
 0x386   : > { %v1529_v14 = vmul.f32 1.442695, %v1520_v13 }
 0x388   : > { %3783 = vpow2.f32 %v1529_v14 }
 0x38b   : > { %v1509_v16 = vpop.xlane.xlu1 %1508  ;;  %v1503_v17 = vpop.xlane.xlu0 %1502 }
 0x38c   : > { %v1523_v18 = vsub.f32 %v1351_v34, %v1509_v16  ;;  %v1521_v19 = vsub.f32 %v1259_v33, %v1503_v17 }
 0x38e   : > { %v1535_v20 = vmul.f32 1.442695, %v1523_v18  ;;  %v1531_v21 = vmul.f32 1.442695, %v1521_v19 }
 0x390   : > { %3785 = vpow2.f32 %v1535_v20 }
 0x391   : > { %3787 = vpow2.f32 %v1531_v21 }
 0x393   : > { %v1506_v15 = vpop.xlane.xlu0 %1505  ;;  %v1515_v35 = vpop.xlane.xlu1 %1514 }
 0x394   : > { %v1522_v22 = vsub.f32 %v1305_v46, %v1506_v15  ;;  %v1525_v36 = vsub.f32 %v4712_v47, %v1515_v35 }
 0x395   : > { %v3784_v24 = vpop.eup %3783 }
 0x396   : > { %v1533_v25 = vmul.f32 1.442695, %v1522_v22  ;;  %v1546_v26 = vsel %vm1494_vm3, %v3784_v24, 0.0  ;;  %v1539_v38 = vmul.f32 1.442695, %v1525_v36 }
 0x397   : > { %1547 = vadd.xlane.f32.xlu0 %v1546_v26  ;;  %v1115_v39 = vpop.permute.xlu1 %1114 }
 0x398   : > { %3789 = vpow2.f32 %v1533_v25  ;;  %v1734_v2 = vsel %vm1594_vm2, %v1115_v39, 0 }
 0x399   : > { %3791 = vpow2.f32 %v1539_v38 }
 0x39b   : > { %v1512_v37 = vpop.xlane.xlu0 %1511 }
 0x39c   : > { %v1524_v40 = vsub.f32 %v1397_v58, %v1512_v37 }
 0x39d   : > { %v4725_v27 = vpop.eup %3785 }
 0x39e   : > { %v1555_v23 = vsel %vm1494_vm3, %v4725_v27, 0.0  ;;  %v3788_v28 = vpop.eup %3787  ;;  %v1537_v42 = vmul.f32 1.442695, %v1524_v40 }
 0x39f   : > { %1556 = vadd.xlane.f32.xlu1 %v1555_v23  ;;  %v1549_v29 = vsel %vm1494_vm3, %v3788_v28, 0.0 }
 0x3a3   : > { %1550 = vadd.xlane.f32.xlu1 %v1549_v29  ;;  %v1518_v41 = vpop.xlane.xlu0 %1517 }
 0x3a4   : > { %v1526_v43 = vsub.f32 %v1489_v0, %v1518_v41 }
 0x3a5   : > { %v4730_v33 = vpop.eup %3789 }
 0x3a6   : > { %v1552_v34 = vsel %vm1494_vm3, %v4730_v33, 0.0  ;;  %v1541_v46 = vmul.f32 1.442695, %v1526_v43  ;;  %v4739_v48 = vpop.eup %3791 }
 0x3a7   : > { %1553 = vadd.xlane.f32.xlu0 %v1552_v34  ;;  %v1561_v51 = vsel %vm1494_vm3, %v4739_v48, 0.0  ;;  %v1113_v52 = vpop.permute.xlu0 %1112 }
 0x3a8   : > { %v1688_v55 = vsel %vm1594_vm2, %v1113_v52, 0 }
 0x3b4   : > { %1116 = vrot.lane.b32.xlu1 %v4664_v50, %s4189_s21 }
 0x3bd   : > { %1118 = vrot.lane.b32.xlu0 %v4664_v50, %s4191_s25 }
 0x3c8   : > { %v1545_v44 = vpop.xlane.xlu1 %1544 }
 0x3c9   : > { %3793 = vrcp.f32 %v1545_v44 }
 0x3ca   : > { %3795 = vpow2.f32 %v1537_v42 }
 0x3cb   : > { %3797 = vpow2.f32 %v1541_v46  ;;  %v3693_v46 = vld [vmem:[%s4583_s11 + $0x38] sm:$0xff]  }
 0x3d6   : > { %v3794_v49 = vpop.eup %3793 }
 0x3d7   : > { %v1575_v47 = vmul.f32 %v3794_v49, %v3782_v10  ;;  %v4743_v53 = vpop.eup %3795  ;;  %v3694_v49 = vld [vmem:[%s4583_s11 + $0x30] sm:$0xff]  }
 0x3d8   : > { %1562 = vadd.xlane.f32.xlu1 %v1561_v51  ;;  %v1558_v56 = vsel %vm1494_vm3, %v4743_v53, 0.0  ;;  %v4751_v57 = vpop.eup %3797 }
 0x3d9   : > { %v1583_v54 = vpack.c.bf16 %v1575_v47, %v1575_v47  ;;  %v1564_v58 = vsel %vm1494_vm3, %v4751_v57, 0.0 }
 0x3db   : > { %3431 = vmatmul.mubr.msk.bf16.vlgmr.msra.gmra.mxu0 %vm1494_vm3, %v1583_v54 }
 0x3dc   : > { %3441 = vmatpush3.bf16.msra.mxu0 %v1688_v55  ;;  %3442 = vmatprep.mubr.msk.bf16.mxu0 %vm4186_vm0, %v4185_v4 }
 0x3dd   : > { %1559 = vadd.xlane.f32.xlu0 %v1558_v56  ;;  %3452 = vmatprep.subr.bf16.mxu0 %v4185_v4 }
 0x3e1   : > { %1565 = vadd.xlane.f32.xlu0 %v1564_v58 }
 0x3e9   : > { %1120 = vrot.lane.b32.xlu1 %v4664_v50, %s4192_s29 }
 0x3f7   : > { %1122 = vrot.lane.b32.xlu0 %v4664_v50, %s4193_s15 }
 0x420   : > { %v1548_v59 = vpop.xlane.xlu0 %1547 }
 0x421   : > { %3799 = vrcp.f32 %v1548_v59  ;;  %v3696_v59 = vld [vmem:[%s4583_s11 + $0x20] sm:$0xff]  }
 0x428   : > { %v1557_v60 = vpop.xlane.xlu1 %1556 }
 0x42c   : > { %v1551_v61 = vpop.xlane.xlu1 %1550 }
 0x42d   : > { %3801 = vrcp.f32 %v1551_v61 }
 0x42e   : > { %v3800_v62 = vpop.eup %3799  ;;  %3803 = vrcp.f32 %v1557_v60 }
 0x42f   : > { %v1576_v63 = vmul.f32 %v3800_v62, %v3784_v24 }
 0x430   : > { %v1554_v0 = vpop.xlane.xlu0 %1553  ;;  %v1117_v6 = vpop.permute.xlu1 %1116 }
 0x431   : > { %v1584_v1 = vpack.c.bf16 %v1576_v63, %v1576_v63  ;;  %3805 = vrcp.f32 %v1554_v0  ;;  %v1780_v10 = vsel %vm1594_vm2, %v1117_v6, 0  ;;  %v3700_v6 = vld [vmem:[%s4583_s11] sm:$0xff]  }
 0x433   : > { %3437 = vmatmul.mubr.msk.bf16.vlgmr.msra.gmra.mxu1 %vm1494_vm3, %v1584_v1  ;;  %v3697_v1 = vld [vmem:[%s4583_s11 + $0x18] sm:$0xff]  }
 0x434   : > { %3447 = vmatpush3.bf16.msra.mxu1 %v1734_v2  ;;  %3448 = vmatprep.mubr.msk.bf16.mxu1 %vm4186_vm0, %v4185_v4  ;;  %v1119_v12 = vpop.permute.xlu0 %1118 }
 0x435   : > { %3458 = vmatprep.subr.bf16.mxu1 %v4185_v4  ;;  %v1826_v16 = vsel %vm1594_vm2, %v1119_v12, 0 }
 0x43a   : > { %v3802_v50 = vpop.eup %3801 }
 0x43b   : > { %v1577_v5 = vmul.f32 %v3802_v50, %v3788_v28  ;;  %v3804_v8 = vpop.eup %3803  ;;  %v3698_v50 = vld [vmem:[%s4583_s11 + $0x10] sm:$0xff]  }
 0x43c   : > { %v1579_v13 = vmul.f32 %v3804_v8, %v4725_v27 }
 0x43d   : > { %v1585_v7 = vpack.c.bf16 %v1577_v5, %v1577_v5  ;;  %v3699_v5 = vld [vmem:[%s4583_s11 + $0x8] sm:$0xff]  }
 0x43e   : > { %v3806_v9 = vpop.eup %3805  ;;  %v1587_v17 = vpack.c.bf16 %v1579_v13, %v1579_v13 }
 0x43f   : > { %3443 = vmatmul.mubr.msk.bf16.vlgmr.msra.gmra.mxu0 %vm1494_vm3, %v1585_v7  ;;  %v1578_v11 = vmul.f32 %v3806_v9, %v4730_v33 }
 0x440   : > { %3453 = vmatpush3.bf16.msra.mxu0 %v1780_v10  ;;  %3454 = vmatprep.mubr.msk.bf16.mxu0 %vm4186_vm0, %v4185_v4 }
 0x441   : > { %3464 = vmatprep.subr.bf16.mxu0 %v4185_v4  ;;  %v1586_v14 = vpack.c.bf16 %v1578_v11, %v1578_v11 }
 0x443   : > { %3449 = vmatmul.mubr.msk.bf16.vlgmr.msra.gmra.mxu1 %vm1494_vm3, %v1586_v14 }
 0x444   : > { %3459 = vmatpush3.bf16.msra.mxu1 %v1826_v16  ;;  %3460 = vmatprep.mubr.msk.bf16.mxu1 %vm4186_vm0, %v4185_v4 }
 0x445   : > { %3470 = vmatprep.subr.bf16.mxu1 %v4185_v4 }
 0x447   : > { %3455 = vmatmul.mubr.msk.bf16.vlgmr.msra.gmra.mxu0 %vm1494_vm3, %v1587_v17 }
 0x448   : > { %3466 = vmatprep.mubr.msk.bf16.mxu0 %vm4186_vm0, %v4185_v4 }
 0x461   : > { %v1563_v18 = vpop.xlane.xlu1 %1562 }
 0x462   : > { %3807 = vrcp.f32 %v1563_v18 }
 0x465   : > { %v1121_v19 = vpop.permute.xlu1 %1120 }
 0x466   : > { %v1872_v20 = vsel %vm1594_vm2, %v1121_v19, 0  ;;  %v1560_v21 = vpop.xlane.xlu0 %1559 }
 0x467   : > { %3809 = vrcp.f32 %v1560_v21  ;;  %3465 = vmatpush3.bf16.msra.mxu0 %v1872_v20 }
 0x468   : > { %3476 = vmatprep.subr.bf16.mxu0 %v4185_v4 }
 0x46a   : > { %v1566_v15 = vpop.xlane.xlu0 %1565 }
 0x46b   : > { %3811 = vrcp.f32 %v1566_v15 }
 0x46e   : > { %v1123_v23 = vpop.permute.xlu0 %1122 }
 0x46f   : > { %v3808_v22 = vpop.eup %3807  ;;  %v1918_v33 = vsel %vm1594_vm2, %v1123_v23, 0 }
 0x470   : > { %v1581_v24 = vmul.f32 %v3808_v22, %v4739_v48 }
 0x472   : > { %v1589_v25 = vpack.c.bf16 %v1581_v24, %v1581_v24 }
 0x474   : > { %v3810_v26 = vpop.eup %3809  ;;  %3467 = vmatmul.mubr.msk.bf16.vlgmr.msra.gmra.mxu0 %vm1494_vm3, %v1589_v25 }
 0x475   : > { %v1580_v27 = vmul.f32 %v3810_v26, %v4743_v53  ;;  %3492 = vmatprep.mubr.msk.bf16.mxu0 %vm4186_vm0, %v4185_v4  ;;  %3477 = vmatpush3.bf16.msra.mxu0 %v3693_v46  ;;  %v3695_v53 = vld [vmem:[%s4583_s11 + $0x28] sm:$0xff]  }
 0x476   : > { %3478 = vmatprep.subr.bf16.mxu0 %v4185_v4 }
 0x477   : > { %v1588_v28 = vpack.c.bf16 %v1580_v27, %v1580_v27 }
 0x478   : > { %v3812_v29 = vpop.eup %3811 }
 0x479   : > { %3461 = vmatmul.mubr.msk.bf16.vlgmr.msra.gmra.mxu1 %vm1494_vm3, %v1588_v28  ;;  %v1582_v34 = vmul.f32 %v3812_v29, %v4751_v57  ;;  %3479 = vmatpush3.bf16.msra.mxu0 %v3694_v49  ;;  %v3701_v49 = vld [vmem:[%s4586_s2 + $0xe0] ss:$16 sps:$4 sm:$0xff]  }
 0x47a   : > { %3471 = vmatpush3.bf16.msra.mxu1 %v1918_v33  ;;  %3472 = vmatprep.mubr.msk.bf16.mxu1 %vm4186_vm0, %v4185_v4 }
 0x47b   : > { %v1590_v35 = vpack.c.bf16 %v1582_v34, %v1582_v34  ;;  %3480 = vmatprep.subr.bf16.mxu0 %v4185_v4 }
 0x47d   : > { %3481 = vmatpush3.bf16.msra.mxu0 %v3695_v53  ;;  %v3712_v53 = vld [vmem:[%s4586_s2 + $0xcc] ss:$16 sps:$4 sm:$0xff]  }
 0x47e   : > { %3482 = vmatprep.subr.bf16.mxu0 %v4185_v4 }
 0x481   : > { %3473 = vmatmul.mubr.msk.bf16.vlgmr.msra.gmra.mxu1 %vm1494_vm3, %v1590_v35  ;;  %3483 = vmatpush3.bf16.msra.mxu0 %v3696_v59 }
 0x482   : > { %2398 = vmatprep.mubr.bf16.mxu1 %v4184_v3  ;;  %3484 = vmatprep.subr.bf16.mxu0 %v4185_v4 }
 0x485   : > { %3485 = vmatpush3.bf16.msra.mxu0 %v3697_v1  ;;  %v3721_v1 = vld [vmem:[%s4586_s2 + $0x84] ss:$16 sps:$4 sm:$0xff]  }
 0x486   : > { %3486 = vmatprep.subr.bf16.mxu0 %v4185_v4 }
 0x489   : > { %3487 = vmatpush3.bf16.msra.mxu0 %v3698_v50  ;;  %v3724_v50 = vld [vmem:[%s4586_s2 + $0x8c] ss:$16 sps:$4 sm:$0xff]  }
 0x48a   : > { %3488 = vmatprep.subr.bf16.mxu0 %v4185_v4 }
 0x48d   : > { %3489 = vmatpush3.bf16.msra.mxu0 %v3699_v5  ;;  %v3727_v5 = vld [vmem:[%s4586_s2 + $0x64] ss:$16 sps:$4 sm:$0xff]  }
 0x48e   : > { %3490 = vmatprep.subr.bf16.mxu0 %v4185_v4 }
 0x491   : > { %3491 = vmatpush3.bf16.msra.mxu0 %v3700_v6  ;;  %v3730_v6 = vld [vmem:[%s4586_s2 + $0x6c] ss:$16 sps:$4 sm:$0xff]  }
 0x49b   : > { %v4794_v36 = vpop.f32.mrf.mxu0 }
 0x49c   : > { %v1960_v25 = vpack.c.bf16 %v4794_v36, %v4794_v36 }
 0x49d   : > { %v3432_v37 = vpop.f32.mrf.mxu0 }
 0x49f   : > { %v1635_v38 = vpop.f32.mrf.mxu0 }
 0x4a1   : > { %v3433_v39 = vpop.f32.mrf.mxu0 }
 0x4a2   : > { %v3180_v39 = vld [vmem:[%s5088_s8] ss:$0 sm:$0xff] }
 0x4f3   : > { %v1678_v40 = vpop.f32.mrf.mxu1 }
 0x4f4   : > { %v1961_v41 = vpack.c.bf16 %v1678_v40, %v1678_v40 }
 0x4f5   : > { %v3438_v42 = vpop.f32.mrf.mxu1 }
 0x4f6   : > { %1969 = vrot.lane.b32.xlu1 %v1961_v41, %s4193_s15 }
 0x4f7   : > { %v1681_v43 = vpop.f32.mrf.mxu1 }
 0x4f8   : > { %v3817_v43 = vld [vmem:[#allocation2] sm:$0xff] }
 0x4f9   : > { %v3439_v44 = vpop.f32.mrf.mxu1 }
 0x4ff   : > { %v1724_v48 = vpop.f32.mrf.mxu0 }
 0x500   : > { %v1962_v51 = vpack.c.bf16 %v1724_v48, %v1724_v48 }
 0x501   : > { %v3444_v47 = vpop.f32.mrf.mxu0 }
 0x502   : > { %1972 = vrot.lane.b32.xlu0 %v1962_v51, %s4192_s29  ;;  %v3703_v51 = vld [vmem:[%s4586_s2 + $0xe4] ss:$16 sps:$4 sm:$0xff]   ;;  %v3704_v47 = vld [vmem:[%s4586_s2 + $0xe8] ss:$16 sps:$4 sm:$0xff]  }
 0x503   : > { %v1727_v52 = vpop.f32.mrf.mxu0  ;;  %v1770_v54 = vpop.f32.mrf.mxu1  ;;  %2366 = vmatprep.subr.bf16.mxu1 %v3703_v51  ;;  %v3764_v51 = vld [vmem:[%s4588_s13 + $0xa0] sm:$0xff]  }
 0x504   : > { %v1963_v55 = vpack.c.bf16 %v1770_v54, %v1770_v54  ;;  %v3709_v52 = vld [vmem:[%s4586_s2 + $0xc4] ss:$16 sps:$4 sm:$0xff]   ;;  %2367 = vmatpush1.bf16.msra.mxu1 %v3701_v49  ;;  %v3707_v54 = vld [vmem:[%s4586_s2 + $0xc0] ss:$16 sps:$4 sm:$0xff]  }
 0x505   : > { %v3445_v56 = vpop.f32.mrf.mxu0  ;;  %v3450_v57 = vpop.f32.mrf.mxu1  ;;  %2368 = vmatprep.subr.bf16.mxu1 %v3709_v52  ;;  %v3763_v49 = vld [vmem:[%s4588_s13 + $0x20] sm:$0xff]   ;;  %v3767_v52 = vld [vmem:[%s4588_s13 + $0x18] sm:$0xff]  }
 0x506   : > { %1975 = vrot.lane.b32.xlu1 %v1963_v55, %s4191_s25  ;;  %v3710_v55 = vld [vmem:[%s4586_s2 + $0xc8] ss:$16 sps:$4 sm:$0xff]  }
 0x507   : > { %v1816_v58 = vpop.f32.mrf.mxu0  ;;  %v1773_v60 = vpop.f32.mrf.mxu1 }
 0x508   : > { %v1964_v61 = vpack.c.bf16 %v1816_v58, %v1816_v58  ;;  %2369 = vmatpush1.bf16.msra.mxu1 %v3707_v54  ;;  %v3715_v60 = vld [vmem:[%s4586_s2 + $0xa4] ss:$16 sps:$4 sm:$0xff]  }
 0x509   : > { %v3456_v62 = vpop.f32.mrf.mxu0  ;;  %v3451_v63 = vpop.f32.mrf.mxu1  ;;  %2370 = vmatprep.subr.bf16.mxu1 %v3715_v60  ;;  %v3769_v54 = vld [vmem:[%s4588_s13 + $0x50] sm:$0xff]   ;;  %v3775_v60 = vld [vmem:[%s4588_s13 + $0x8] sm:$0xff]  }
 0x50a   : > { %1978 = vrot.lane.b32.xlu0 %v1964_v61, %s4189_s21  ;;  %v3718_v61 = vld [vmem:[%s4586_s2 + $0xac] ss:$16 sps:$4 sm:$0xff]   ;;  %v3713_v62 = vld [vmem:[%s4586_s2 + $0xa0] ss:$16 sps:$4 sm:$0xff]   ;;  %v3716_v63 = vld [vmem:[%s4586_s2 + $0xa8] ss:$16 sps:$4 sm:$0xff]  }
 0x50b   : > { %v1819_v0 = vpop.f32.mrf.mxu0 }
 0x50c   : > { %2371 = vmatpush1.bf16.msra.mxu1 %v3713_v62  ;;  %v3719_v0 = vld [vmem:[%s4586_s2 + $0x80] ss:$16 sps:$4 sm:$0xff]  }
 0x50d   : > { %v3457_v2 = vpop.f32.mrf.mxu0  ;;  %2372 = vmatprep.subr.bf16.mxu1 %v3721_v1  ;;  %v3777_v62 = vld [vmem:[%s4588_s13 + $0x40] sm:$0xff]  }
 0x50e   : > { %v3722_v2 = vld [vmem:[%s4586_s2 + $0x88] ss:$16 sps:$4 sm:$0xff]   ;;  %v3780_v1 = vld [vmem:[%s4588_s13 + $0x80] sm:$0xff]  }
 0x510   : > { %2373 = vmatpush1.bf16.msra.mxu1 %v3719_v0  ;;  %v3779_v0 = vld [vmem:[%s4588_s13] sm:$0xff]  }
 0x511   : > { %2374 = vmatprep.subr.bf16.mxu1 %v3727_v5 }
 0x534   : > { %v1908_v7 = vpop.f32.mrf.mxu0 }
 0x535   : > { %v1966_v8 = vpack.c.bf16 %v1908_v7, %v1908_v7  ;;  %v3725_v7 = vld [vmem:[%s4586_s2 + $0x60] ss:$16 sps:$4 sm:$0xff]  }
 0x536   : > { %v3468_v9 = vpop.f32.mrf.mxu0  ;;  %2375 = vmatpush1.bf16.msra.mxu1 %v3725_v7 }
 0x537   : > { %1984 = vrot.lane.b32.xlu0 %v1966_v8, %s4187_s10  ;;  %v3728_v8 = vld [vmem:[%s4586_s2 + $0x68] ss:$16 sps:$4 sm:$0xff]   ;;  %v3733_v9 = vld [vmem:[%s4586_s2 + $0x44] ss:$16 sps:$4 sm:$0xff]  }
 0x538   : > { %v1911_v10 = vpop.f32.mrf.mxu0  ;;  %2376 = vmatprep.subr.bf16.mxu1 %v3733_v9 }
 0x539   : > { %v1862_v11 = vpop.f32.mrf.mxu1  ;;  %v3736_v10 = vld [vmem:[%s4586_s2 + $0x4c] ss:$16 sps:$4 sm:$0xff]  }
 0x53a   : > { %v1965_v12 = vpack.c.bf16 %v1862_v11, %v1862_v11  ;;  %v3469_v13 = vpop.f32.mrf.mxu0  ;;  %v3731_v11 = vld [vmem:[%s4586_s2 + $0x40] ss:$16 sps:$4 sm:$0xff]  }
 0x53b   : > { %v3462_v14 = vpop.f32.mrf.mxu1  ;;  %v3739_v13 = vld [vmem:[%s4586_s2 + $0x24] ss:$16 sps:$4 sm:$0xff]   ;;  %2377 = vmatpush1.bf16.msra.mxu1 %v3731_v11 }
 0x53c   : > { %1981 = vrot.lane.b32.xlu1 %v1965_v12, %s4190_s23  ;;  %v3734_v12 = vld [vmem:[%s4586_s2 + $0x48] ss:$16 sps:$4 sm:$0xff]   ;;  %v3742_v14 = vld [vmem:[%s4586_s2 + $0x2c] ss:$16 sps:$4 sm:$0xff]   ;;  %2378 = vmatprep.subr.bf16.mxu1 %v3739_v13 }
 0x53d   : > { %v1865_v16 = vpop.f32.mrf.mxu1 }
 0x53e   : > { %v3737_v16 = vld [vmem:[%s4586_s2 + $0x20] ss:$16 sps:$4 sm:$0xff]  }
 0x53f   : > { %v3463_v17 = vpop.f32.mrf.mxu1  ;;  %2379 = vmatpush1.bf16.msra.mxu1 %v3737_v16 }
 0x540   : > { %v3740_v17 = vld [vmem:[%s4586_s2 + $0x28] ss:$16 sps:$4 sm:$0xff]  }
 0x541   : > { %v1954_v18 = vpop.f32.mrf.mxu1 }
 0x542   : > { %v1967_v19 = vpack.c.bf16 %v1954_v18, %v1954_v18  ;;  %v3745_v18 = vld [vmem:[%s4586_s2 + $0x4] ss:$16 sps:$4 sm:$0xff]  }
 0x543   : > { %v3474_v20 = vpop.f32.mrf.mxu1  ;;  %2380 = vmatprep.subr.bf16.mxu1 %v3745_v18 }
 0x544   : > { %1987 = vrot.lane.b32.xlu1 %v1967_v19, %s4188_s30  ;;  %v3748_v19 = vld [vmem:[%s4586_s2 + $0xc] ss:$16 sps:$4 sm:$0xff]   ;;  %v3743_v20 = vld [vmem:[%s4586_s2] ss:$16 sps:$4 sm:$0xff]  }
 0x545   : > { %v1957_v4 = vpop.f32.mrf.mxu1  ;;  %2381 = vmatpush1.bf16.msra.mxu1 %v3743_v20 }
 0x546   : > { %v3746_v4 = vld [vmem:[%s4586_s2 + $0x8] ss:$16 sps:$4 sm:$0xff]  }
 0x547   : > { %v3475_v21 = vpop.f32.mrf.mxu1 }
 0x548   : > { %v3749_v21 = vld [vmem:[%s4588_s13 + $0x78] sm:$0xff]  }
 0x549   : > { %3316 = vmatprep.subr.bf16.mxu1 %v3749_v21 }
 0x568   : > { %v1970_v15 = vpop.permute.xlu1 %1969 }
 0x569   : > { %v1991_v26 = vsel %vm1125_vm1, %v1960_v25, %v1970_v15  ;;  %v3750_v15 = vld [vmem:[%s4588_s13 + $0xf8] sm:$0xff]  }
 0x574   : > { %v1973_v22 = vpop.permute.xlu0 %1972 }
 0x575   : > { %v1994_v23 = vsel %vm1992_vm4, %v1991_v26, %v1973_v22 }
 0x578   : > { %v1976_v24 = vpop.permute.xlu1 %1975 }
 0x579   : > { %v1997_v29 = vsel %vm1995_vm5, %v1994_v23, %v1976_v24 }
 0x57c   : > { %v1979_v27 = vpop.permute.xlu0 %1978 }
 0x57d   : > { %v2000_v33 = vsel %vm1998_vm6, %v1997_v29, %v1979_v27  ;;  %v3189_v27 = vld [vmem:[%s795_s28] ss:$0 sm:$0xff] }
 0x5a9   : > { %v1985_v35 = vpop.permute.xlu0 %1984 }
 0x5ae   : > { %v1982_v28 = vpop.permute.xlu1 %1981 }
 0x5af   : > { %v2003_v34 = vsel %vm2001_vm7, %v2000_v33, %v1982_v28  ;;  %v3190_v28 = vld [vmem:[%s798_s4] ss:$0 sm:$0xff] }
 0x5b0   : > { %v2006_v37 = vsel %vm2004_vm8, %v2003_v34, %v1985_v35  ;;  %v3751_v34 = vld [vmem:[%s4588_s13 + $0x38] sm:$0xff]  }
 0x5b1   : > { %v3752_v35 = vld [vmem:[%s4588_s13 + $0xb8] sm:$0xff]  }
 0x5b6   : > { %v1988_v36 = vpop.permute.xlu1 %1987 }
 0x5b7   : > { %v2009_v38 = vsel %vm2007_vm9, %v2006_v37, %v1988_v36  ;;  %v3753_v36 = vld [vmem:[%s4588_s13 + $0x70] sm:$0xff]  }
 0x5b8   : > { %3493 = vmatmul.mubr.bf16.vlgmr.msra.gmra.mxu0 %v2009_v38  ;;  %v3754_v38 = vld [vmem:[%s4588_s13 + $0xf0] sm:$0xff]  }
 0x5b9   : > { %2439 = vmatprep.mubr.bf16.mxu0 %v4184_v3  ;;  %v3706_v3 = vld [vmem:[%s4586_s2 + $0xec] ss:$16 sps:$4 sm:$0xff]  }
 0x5ba   : > { %2407 = vmatprep.subr.bf16.mxu0 %v3706_v3  ;;  %v3766_v3 = vld [vmem:[%s4588_s13 + $0xd8] sm:$0xff]  }
 0x5bb   : > { %2408 = vmatpush1.bf16.msra.mxu0 %v3704_v47  ;;  %v3765_v47 = vld [vmem:[%s4588_s13 + $0x58] sm:$0xff]  }
 0x5bc   : > { %2409 = vmatprep.subr.bf16.mxu0 %v3712_v53  ;;  %v3768_v53 = vld [vmem:[%s4588_s13 + $0x98] sm:$0xff]  }
 0x5bf   : > { %2410 = vmatpush1.bf16.msra.mxu0 %v3710_v55  ;;  %v3770_v55 = vld [vmem:[%s4588_s13 + $0xd0] sm:$0xff]  }
 0x5c0   : > { %2411 = vmatprep.subr.bf16.mxu0 %v3718_v61  ;;  %v3776_v61 = vld [vmem:[%s4588_s13 + $0x88] sm:$0xff]  }
 0x5c3   : > { %2412 = vmatpush1.bf16.msra.mxu0 %v3716_v63  ;;  %v3778_v63 = vld [vmem:[%s4588_s13 + $0xc0] sm:$0xff]  }
 0x5c4   : > { %2413 = vmatprep.subr.bf16.mxu0 %v3724_v50  ;;  %v2200_v50 = vsub.s32 3, %v4633_v30 }
 0x5c7   : > { %2414 = vmatpush1.bf16.msra.mxu0 %v3722_v2  ;;  %v2184_v2 = vld [vmem:[%s4579_s1] sm:$0xf] }
 0x5c8   : > { %2415 = vmatprep.subr.bf16.mxu0 %v3730_v6  ;;  %v2189_v5 = vrot.slane %v2184_v2, %v854_v32  ;;  %v2197_v6 = vrot.slane %v2184_v2, %v862_v45  ;;  %v2193_v7 = vrot.slane %v2184_v2, %v858_v31 }
 0x5cb   : > { %2416 = vmatpush1.bf16.msra.mxu0 %v3728_v8  ;;  %v2201_v8 = vrot.slane %v2184_v2, %v2200_v50 }
 0x5cc   : > { %2417 = vmatprep.subr.bf16.mxu0 %v3736_v10 }
 0x5cf   : > { %2418 = vmatpush1.bf16.msra.mxu0 %v3734_v12 }
 0x5d0   : > { %2419 = vmatprep.subr.bf16.mxu0 %v3742_v14 }
 0x5d3   : > { %2420 = vmatpush1.bf16.msra.mxu0 %v3740_v17 }
 0x5d4   : > { %2421 = vmatprep.subr.bf16.mxu0 %v3748_v19 }
 0x5d7   : > { %2422 = vmatpush1.bf16.msra.mxu0 %v3746_v4 }
 0x5d8   : > { %3338 = vmatprep.subr.bf16.mxu0 %v3750_v15 }
 0x678   : > { %v2116_v40 = vpop.f32.mrf.mxu0 }
 0x679   : > { %v2117_v41 = vadd.f32 %v3180_v39, %v2116_v40  ;;  %v3755_v39 = vld [vmem:[%s4588_s13 + $0x30] sm:$0xff]  }
 0x67a   : > { %v3494_v42 = vpop.f32.mrf.mxu0  ;;  %v3756_v40 = vld [vmem:[%s4588_s13 + $0xb0] sm:$0xff]  }
 0x67b   : > { %v2122_v44 = vadd.f32 %v3817_v43, %v2117_v41  ;;  %v3757_v41 = vld [vmem:[%s4588_s13 + $0x68] sm:$0xff]  }
 0x67c   : > { %v2119_v46 = vpop.f32.mrf.mxu0  ;;  %v3758_v42 = vld [vmem:[%s4588_s13 + $0xe8] sm:$0xff]  }
 0x67d   : > { %2125 = vadd.xlane.f32.xlu0 %v2122_v44  ;;  %v3759_v43 = vld [vmem:[%s4588_s13 + $0x28] sm:$0xff]   ;;  %v3761_v46 = vld [vmem:[%s4588_s13 + $0x60] sm:$0xff]  }
 0x67e   : > { %v3495_v48 = vpop.f32.mrf.mxu0 }
 0x67f   : > { %v3762_v48 = vld [vmem:[%s4588_s13 + $0xe0] sm:$0xff]  }
 0x706   : > { %v2126_v56 = vpop.xlane.xlu0 %2125 }
 0x707   : > { %v2128_v57 = vmul.f32 0.0078125, %v2126_v56  ;;  %v3771_v56 = vld [vmem:[%s4588_s13 + $0x10] sm:$0xff]  }
 0x709   : > { %v2129_v58 = vsub.f32 %v2122_v44, %v2128_v57  ;;  %v3760_v44 = vld [vmem:[%s4588_s13 + $0xa8] sm:$0xff]   ;;  %v3772_v57 = vld [vmem:[%s4588_s13 + $0x90] sm:$0xff]  }
 0x70b   : > { %v2130_v59 = vmul.f32 %v2129_v58, %v2129_v58 }
 0x70d   : > { %2131 = vadd.xlane.f32.xlu1 %v2130_v59  ;;  %v3774_v59 = vld [vmem:[%s4588_s13 + $0xc8] sm:$0xff]  }
 0x796   : > { %v2132_v22 = vpop.xlane.xlu1 %2131 }
 0x797   : > { %v2133_v24 = vmul.f32 0.0078125, %v2132_v22 }
 0x799   : > { %v2134_v25 = vadd.f32 1e-05, %v2133_v24 }
 0x79b   : > { %3813 = vrsqrt.f32 %v2134_v25 }
 0x7a8   : > { %v3814_v26 = vpop.eup %3813 }
 0x7a9   : > { %v2136_v23 = vmul.f32 %v3814_v26, %v2129_v58  ;;  %v3773_v58 = vld [vmem:[%s4588_s13 + $0x48] sm:$0xff]   ;;  %s5093_s13 = sld [smem:[#allocation23_spill]] }
 0x7ab   : > { %v2143_v29 = vmul.f32 %v3189_v27, %v2136_v23  ;;  %v3223_v27 = vld [vmem:[%s808_s16] ss:$0 sm:$0xff] }
 0x7ad   : > { %v4871_v33 = vadd.f32 %v3190_v28, %v2143_v29 }
 0x7af   : > { %v2151_v37 = vpack.c.bf16 %v4871_v33, %v4871_v33  ;;  %p3258_p3 = scmp.ne.s32.totalorder %s5093_s13, 1 }
 0x7b1   : > { %2399 = vmatmul.mubr.bf16.vlgmr.msra.gmra.mxu1 %v2151_v37  ;;  %2440 = vmatmul.mubr.bf16.vlgmr.msra.gmra.mxu0 %v2151_v37 }
 0x7b2   : > { %3317 = vmatpush3.bf16.msra.mxu1 %v3751_v34  ;;  %3339 = vmatpush3.bf16.msra.mxu0 %v3752_v35 }
 0x7b3   : > { %3318 = vmatprep.subr.bf16.mxu1 %v3753_v36  ;;  %3340 = vmatprep.subr.bf16.mxu0 %v3754_v38 }
 0x7b6   : > { %3319 = vmatpush3.bf16.msra.mxu1 %v3755_v39  ;;  %3341 = vmatpush3.bf16.msra.mxu0 %v3756_v40 }
 0x7b7   : > { %3320 = vmatprep.subr.bf16.mxu1 %v3757_v41  ;;  %3342 = vmatprep.subr.bf16.mxu0 %v3758_v42 }
 0x7ba   : > { %3321 = vmatpush3.bf16.msra.mxu1 %v3759_v43  ;;  %3343 = vmatpush3.bf16.msra.mxu0 %v3760_v44 }
 0x7bb   : > { %3322 = vmatprep.subr.bf16.mxu1 %v3761_v46  ;;  %3344 = vmatprep.subr.bf16.mxu0 %v3762_v48 }
 0x7be   : > { %3323 = vmatpush3.bf16.msra.mxu1 %v3763_v49  ;;  %3345 = vmatpush3.bf16.msra.mxu0 %v3764_v51 }
 0x7bf   : > { %3324 = vmatprep.subr.bf16.mxu1 %v3765_v47  ;;  %3346 = vmatprep.subr.bf16.mxu0 %v3766_v3  ;;  %v3256_v3 = vld [vmem:[%s801_s18] ss:$0 sm:$0xff] }
 0x7c2   : > { %3325 = vmatpush3.bf16.msra.mxu1 %v3767_v52  ;;  %3347 = vmatpush3.bf16.msra.mxu0 %v3768_v53  ;;  %v3257_v53 = vld [vmem:[%s679_s14] ss:$0 sm:$0xff] }
 0x7c3   : > { %3326 = vmatprep.subr.bf16.mxu1 %v3769_v54  ;;  %3348 = vmatprep.subr.bf16.mxu0 %v3770_v55 }
 0x7c6   : > { %3327 = vmatpush3.bf16.msra.mxu1 %v3771_v56  ;;  %3349 = vmatpush3.bf16.msra.mxu0 %v3772_v57 }
 0x7c7   : > { %3328 = vmatprep.subr.bf16.mxu1 %v3773_v58  ;;  %3350 = vmatprep.subr.bf16.mxu0 %v3774_v59 }
 0x7ca   : > { %3329 = vmatpush3.bf16.msra.mxu1 %v3775_v60  ;;  %3351 = vmatpush3.bf16.msra.mxu0 %v3776_v61 }
 0x7cb   : > { %3330 = vmatprep.subr.bf16.mxu1 %v3777_v62  ;;  %3352 = vmatprep.subr.bf16.mxu0 %v3778_v63 }
 0x7ce   : > { %3331 = vmatpush3.bf16.msra.mxu1 %v3779_v0  ;;  %3353 = vmatpush3.bf16.msra.mxu0 %v3780_v1 }
 0x871   : > { %v2400_v9 = vpop.f32.mrf.mxu1  ;;  %v2441_v10 = vpop.f32.mrf.mxu0 }
 0x872   : > { %v2401_v11 = vadd.f32 %v2400_v9, %v2189_v5  ;;  %v2442_v12 = vadd.f32 %v2441_v10, %v2197_v6 }
 0x873   : > { %v2402_v13 = vpop.f32.mrf.mxu1  ;;  %v2443_v14 = vpop.f32.mrf.mxu0 }
 0x874   : > { %v2403_v16 = vadd.f32 %v2402_v13, %v2193_v7  ;;  %v2444_v17 = vadd.f32 %v2443_v14, %v2201_v8  ;;  %v2448_v18 = vmax.f32 %v2401_v11, 0.0  ;;  %v2450_v19 = vmax.f32 %v2442_v12, 0.0 }
 0x875   : > { %v2404_v20 = vpop.f32.mrf.mxu1  ;;  %v2445_v32 = vpop.f32.mrf.mxu0 }
 0x876   : > { %v2449_v4 = vmax.f32 %v2403_v16, 0.0  ;;  %v2451_v21 = vmax.f32 %v2444_v17, 0.0  ;;  %v2452_v22 = vpack.c.bf16 %v2448_v18, %v2448_v18  ;;  %v2454_v24 = vpack.c.bf16 %v2450_v19, %v2450_v19 }
 0x877   : > { %v2405_v45 = vpop.f32.mrf.mxu1  ;;  %v2446_v15 = vpop.f32.mrf.mxu0 }
 0x878   : > { %v2453_v30 = vpack.c.bf16 %v2449_v4, %v2449_v4  ;;  %v2455_v31 = vpack.c.bf16 %v2451_v21, %v2451_v21 }
 0x87a   : > { %2751 = vmatprep.mubr.bf16.mxu1 %v2453_v30  ;;  %2791 = vmatprep.mubr.bf16.mxu0 %v2455_v31 }
 0x87b   : > { %2752 = vmatmul.mubr.bf16.vlgmr.msra.gmra.mxu1 %v2452_v22  ;;  %2792 = vmatmul.mubr.bf16.vlgmr.msra.gmra.mxu0 %v2454_v24 }
 0x93b   : > { %v3332_v25 = vpop.f32.mrf.mxu1  ;;  %v3354_v26 = vpop.f32.mrf.mxu0 }
 0x93d   : > { %v3333_v23 = vpop.f32.mrf.mxu1  ;;  %v3355_v28 = vpop.f32.mrf.mxu0 }
 0x93e   : > { %v3334_v29 = vadd.f32 %v3333_v23, %v3332_v25  ;;  %v3356_v36 = vadd.f32 %v3355_v28, %v3354_v26 }
 0x93f   : > { %v3335_v34 = vpop.f32.mrf.mxu1  ;;  %v3357_v35 = vpop.f32.mrf.mxu0 }
 0x940   : > { %v2754_v37 = vadd.f32 %v3334_v29, %v3223_v27 }
 0x941   : > { %v3336_v38 = vpop.f32.mrf.mxu1  ;;  %v3358_v39 = vpop.f32.mrf.mxu0 }
 0x942   : > { %v2794_v40 = vadd.f32 %v3356_v36, %v2754_v37 }
 0x944   : > { %v2799_v41 = vadd.f32 %v2794_v40, %v4871_v33 }
 0x946   : > { %2802 = vadd.xlane.f32.xlu0 %v2799_v41 }
 0x9cf   : > { %v2803_v42 = vpop.xlane.xlu0 %2802 }
 0x9d0   : > { %v2804_v43 = vmul.f32 0.0078125, %v2803_v42 }
 0x9d2   : > { %v2805_v44 = vsub.f32 %v2799_v41, %v2804_v43 }
 0x9d4   : > { %v2806_v46 = vmul.f32 %v2805_v44, %v2805_v44 }
 0x9d6   : > { %2807 = vadd.xlane.f32.xlu0 %v2806_v46 }
 0xa5f   : > { %v2808_v48 = vpop.xlane.xlu0 %2807 }
 0xa60   : > { %v2809_v49 = vmul.f32 0.0078125, %v2808_v48 }
 0xa62   : > { %v2810_v51 = vadd.f32 1e-05, %v2809_v49 }
 0xa64   : > { %3815 = vrsqrt.f32 %v2810_v51 }
 0xa71   : > { %v3816_v47 = vpop.eup %3815 }
 0xa72   : > { %v2812_v52 = vmul.f32 %v3816_v47, %v2805_v44 }
 0xa74   : > { %v2819_v33 = vmul.f32 %v3256_v3, %v2812_v52  ;;  %2831 = sbr.rel (%p3258_p3) target bundleno = 2682 (0xa7a), region = 116 }
 0xa76   : > { %v2826_v54 = vadd.f32 %v3257_v53, %v2819_v33 }
 0xa78   : > { %2827 = vst [vmem:[#allocation2] sm:$0xff] %v2826_v54 }
 0xa79   : > { %2832 = vst [vmem:[%s789_s9] sm:$0xff] %v2826_v54 }
 0xa7a PF: > { %s5094_s10 = sld [smem:[#allocation24_spill]]  ;;  %s2847_s14 = sshll.u32 %s789_s9, 4  ;;  %s2848_s14 = int_to_ptr.vmem [resolvable:$true] %s2847_s14 }
 0xa7b   : > { %s5095_s30 = sld [smem:[#allocation32_spill]]  ;;  %s5098_s29 = sand.u32 1, %s4144_s17  }
 0xa7c   : > { %s5096_s23 = sld [smem:[#allocation48_spill]]  ;;  %s2834_s15 = scalar_lea.sflag [#allocation5], %s5098_s29 }
 0xa7d   : > { %s4040_s6 = scalar_lea.vmem %s2848_s14, 128  ;;  %s4194_s20 = smov [#allocation14]  }
 0xa7e   : > { %p4041_p9 = scmp.ne.s32.totalorder %s2848_s14, %s4040_s6  ;;  %s4044_s12 = sshll.u32 %s4194_s20, 4  ;;  %s4045_s12 = int_to_ptr.vmem [resolvable:$false] %s4044_s12 }
 0xa7f   : > { %s4046_s8 = scalar_lea.vmem %s4045_s12, 256  ;;  %p4047_p0 = scmp.lt.s32.totalorder %s2848_s14, %s4045_s12 }
 0xa80   : > { %s3260_s21 = sshll.u32 %s5094_s10, 7  ;;  %p4048_p8 = scmp.lt.s32.totalorder %s4046_s8, %s4040_s6 }
 0xa81   : > { %p5099_p7 = scmp.ne.s32.totalorder %s5095_s30, 0 }
 0xa82   : > { %s5097_s25 = smov %s5096_s23  ;;  %s2845_s27 = scalar_lea.hbm %s5096_s23, %s3260_s21 }
 0xa83   : > { %p4042_p1 = pnand %p4041_p9, %p5099_p7  ;;  %p4049_p5 = por %p4048_p8, %p4047_p0 }
 0xa85   : > { %p4043_p13 = pneg %p4042_p1 }
 0xa87   : > { %p4050_p11 = pnand %p4049_p5, %p4043_p13 }
 0xa89   : > { %4053 = shalt.err (!%p4050_p11)
}
 0xa8a   : > { %s4054_s5 = scalar_lea.hbm %s2845_s27, 128  ;;  %s4058_s24 = scalar_lea.hbm %s5097_s25, 256 }
 0xa8b   : > { %p4055_p12 = scmp.ne.s32.totalorder %s2845_s27, %s4054_s5  ;;  %p4059_p6 = scmp.lt.s32.totalorder %s2845_s27, %s5097_s25 }
 0xa8c   : > { %p4060_p10 = scmp.lt.s32.totalorder %s4058_s24, %s4054_s5 }
 0xa8d   : > { %p4056_p2 = pnand %p4055_p12, %p5099_p7 }
 0xa8e   : > { %p4061_p3 = por %p4060_p10, %p4059_p6 }
 0xa8f   : > { %p4057_p4 = pneg %p4056_p2 }
 0xa91   : > { %p4062_p9 = pnand %p4061_p3, %p4057_p4 }
 0xa93   : > { %4065 = shalt.err (!%p4062_p9)
}
 0xa94   : > { %3520 = dma.vmem_to_hbm [thread:$0]  (%p5099_p7), %s2848_s14, 128, %s2845_s27, %s2834_s15  }
 0xa95 PF: > { %s5100_s19 = sld [smem:[#allocation27_spill]] }
 0xa96   : > { %s5101_s3 = sld [smem:[#allocation21_spill]] }
 0xa97   : > { %s5102_s4 = sld [smem:[#allocation33_spill]] }
 0xa9b   : > { %p3555_p1 = scmp.ge.s32.totalorder %s5100_s19, 2 }
 0xa9c   : > { %s2859_s1 = sand.u32 1, %s5101_s3  }
 0xa9d   : > { %p5103_p13 = scmp.ne.s32.totalorder %s5102_s4, 0  ;;  %s2860_s28 = scalar_lea.sflag [#allocation5], %s2859_s1 }
 0xa9f   : > { %p3549_p0 = pnand %p3555_p1, %p5103_p13 }
 0xaa1   : > { %p3550_p8 = pneg %p3549_p0 }
 0xaa3   : > { %4123 = dma.done.wait (%p3550_p8), %s2860_s28, 128  }
 0xaa4   : > { %4125 = vsyncadd (%p3550_p8), %s2860_s28, 4294967168  ;;  %s31_s23 = sadd.s32 1, %s5100_s19   ;;  %s5104_s29 = sld [smem:[#allocation19_spill]] }
 0xaa5   : > { %p28_p5 = scmp.ge.s32.totalorder %s31_s23, 6   ;;  %s5105_s30 = sld [smem:[#allocation20_spill]] }
 0xaa6   : > { %s5106_s15 = sld [smem:[#allocation30_spill]]  ;;  %s5113_s16 = smov %s4144_s17 }
 0xaa7   : > { %s5107_s11 = sld [smem:[#allocation22_spill]] }
 0xaa8   : > { %s5108_s18 = sld [smem:[#allocation31_spill]] }
 0xaa9   : > { %s5109_s19 = sld [smem:[#allocation25_spill]]  ;;  %30 = sbr.rel (!%p28_p5) target bundleno = 26 (0x1a), region = 217 }
 0xaaa   : > { %s5110_s20 = sld [smem:[#allocation26_spill]] }
 0xaab   : > { %s5111_s21 = sld [smem:[#allocation28_spill]] }
 0xaac   : > { %s5112_s22 = sld [smem:[#allocation29_spill]] }
 0xaad   : > { %s5114_s17 = smov %s5107_s11 }
 0xaae   :  { %2865 = vsyncpa [#allocation4], 1 }
 0xaaf   :  { %2867 = vsyncpa [#allocation4 + $0x1], 1 }
 0xab0   :  { %2868 = vsyncpa [#allocation7], 1 }
 0xab1   :  { %2869 = vsyncpa [#allocation5], 1 }
 0xab2   :  { %2871 = vsyncpa [#allocation5 + $0x1], 1 }

</bundles_post_ra>
